<compile_context>
chip_gen: v6e
topology: v6e:2x2x1
jax: 0.10.0
libtpu: 0.0.40
codegen_flags: <defaults>
</compile_context>

<pallas_src>
import jax
import jax.numpy as jnp
import numpy as np
from jax.experimental import pallas as pl
from jax.experimental.pallas import tpu as pltpu

BETA = 0.9            # LIF decay
THRESHOLD = 1.0       # snn.Leaky default firing threshold (reset_mechanism="subtract")
ENC_THRESHOLD = 0.01  # spikegen.latency threshold
NUM_STEPS = 5
IN_DIM = 784
HID_DIM = 200
OUT_DIM = 10

# lane-padded sizes used inside the kernel
HID_PAD = 256         # 200 -> 256 (2 full 128-lane tiles)
OUT_PAD = 128         # 10  -> 128 (1 full 128-lane tile)


def _round_up(n, m):
    return ((n + m - 1) // m) * m


def _snn_kernel(st_ref, w1_ref, b1_ref, w2_ref, b2_ref, spk_ref, mem_ref):
    """One batch tile: one-hot latency input + batched fc1 + per-step LIF/fc2."""
    num_steps = spk_ref.shape[0]
    tb = st_ref.shape[0]

    # --- one-hot-in-time spike input, built directly in bf16 --------------------
    # spike_time arrives precomputed as int8 from the wrapper; a single
    # broadcasted_iota compare builds all T steps at once (no f32 temporary,
    # no per-step sublane concatenation).
    st = st_ref[...].astype(jnp.int32)                               # (TB, 784)
    step_ids = jax.lax.broadcasted_iota(jnp.int32, (num_steps, tb, IN_DIM), 0)
    spikes_in = (st[None, :, :] == step_ids).astype(jnp.bfloat16)    # (T, TB, 784)
    # collapse leading dims: TB is a multiple of 32 so this is tile-aligned
    spikes_in = spikes_in.reshape(num_steps * tb, IN_DIM)            # (T*TB, 784)

    w1 = w1_ref[...]                                                 # (784, 256) bf16
    w2 = w2_ref[...]                                                 # (256, 128) bf16

    # fc1 for ALL time steps in one MXU pass; bias added once (single broadcast).
    cur1_all = jnp.dot(spikes_in, w1,
                       preferred_element_type=jnp.float32) + b1_ref[...]  # (T*TB, 256) f32

    # hoist the b2 broadcast out of the unrolled loop (JAX does not CSE it)
    b2 = jnp.broadcast_to(b2_ref[...], (tb, OUT_PAD))                # (TB, 128) f32

    mem1 = jnp.zeros((tb, HID_PAD), jnp.float32)
    mem2 = jnp.zeros((tb, OUT_PAD), jnp.float32)

    # TODO(synk): surrogate.fast_sigmoid only changes the backward pass; the forward
    # pass is a plain Heaviside, which is what we implement here.
    for step in range(num_steps):                                    # static unroll (T = 5)
        cur1 = cur1_all[step * tb:(step + 1) * tb, :]

        # Leaky LIF, subtract-reset computed from the previous membrane
        reset1 = jnp.where(mem1 > THRESHOLD, THRESHOLD, 0.0)
        mem1 = BETA * mem1 + cur1 - reset1
        spk1 = (mem1 > THRESHOLD).astype(jnp.bfloat16)

        cur2 = jnp.dot(spk1, w2, preferred_element_type=jnp.float32) + b2
        reset2 = jnp.where(mem2 > THRESHOLD, THRESHOLD, 0.0)
        mem2 = BETA * mem2 + cur2 - reset2

        # full (TB, 128) lane-dense, unmasked stores; spikes in bf16 (exact 0/1)
        spk_ref[step] = (mem2 > THRESHOLD).astype(jnp.bfloat16)
        mem_ref[step] = mem2


def spiking_network_forward(x, w1, b1, w2, b2, num_steps=NUM_STEPS, slice_output=True):
    """x: (B, 1, 28, 28); w1: (200, 784); b1: (200,); w2: (10, 200); b2: (10,).

    Returns torch.stack(spk2_rec) / torch.stack(mem2_rec) equivalents:
    (num_steps, B, 10) f32 when slice_output=True; padded (num_steps, B_pad, 128)
    bf16/f32 when slice_output=False (skips an extra HBM narrowing pass).
    """
    B = x.shape[0]
    x_flat = x.reshape(B, -1).astype(jnp.float32)

    # Latency-encoding stats span the whole batch -> computed here, outside the
    # batch-tiled kernel; the elementwise rescale+round fuses with the same pass
    # and produces a small int8 spike-time map fed to the kernel.
    x_min = jnp.min(x_flat)
    x_max = jnp.max(x_flat)
    rng = x_max - x_min
    # TODO(synk): constant input (max == min) would give inf/NaN in the PyTorch
    # module; we guard it (all spike times -> last step) instead of propagating NaN.
    inv_range = jnp.where(rng > 0, 1.0 / rng, 0.0)
    x_resc = (x_flat - x_min) * inv_range
    tau_lin = (num_steps - 1) / (1.0 - ENC_THRESHOLD)
    spike_time = jnp.round(
        jnp.minimum(tau_lin * (1.0 - x_resc), float(num_steps - 1))
    ).astype(jnp.int8)                                               # values in [0, T-1]

    # Batch tiling: TB multiple of 32 (int8 (32,128) tile), up to 256 rows per tile;
    # when B allows, keep >= 2 grid tiles so v7x can split the parallel axis across
    # its two TensorCores.
    TB = min(256, _round_up(B, 32))
    if B > 32 and _round_up(B, TB) // TB < 2:
        TB = _round_up((B + 1) // 2, 32)
    B_pad = _round_up(B, TB)
    if B_pad != B:
        # pad with -1 -> padded rows never spike (they are sliced off anyway)
        spike_time = jnp.pad(spike_time, ((0, B_pad - B), (0, 0)), constant_values=-1)

    # PyTorch (out, in) weights -> (in, out_pad), zero-padded, bf16 for the MXU;
    # biases stay f32.
    w1_p = (jnp.zeros((IN_DIM, HID_PAD), jnp.float32)
            .at[:, :HID_DIM].set(w1.T.astype(jnp.float32))).astype(jnp.bfloat16)
    b1_p = jnp.zeros((1, HID_PAD), jnp.float32).at[:, :HID_DIM].set(b1.astype(jnp.float32))
    w2_p = (jnp.zeros((HID_PAD, OUT_PAD), jnp.float32)
            .at[:HID_DIM, :OUT_DIM].set(w2.T.astype(jnp.float32))).astype(jnp.bfloat16)
    b2_p = jnp.zeros((1, OUT_PAD), jnp.float32).at[:, :OUT_DIM].set(b2.astype(jnp.float32))

    out_shape = (
        jax.ShapeDtypeStruct((num_steps, B_pad, OUT_PAD), jnp.bfloat16),  # spikes: exact 0/1
        jax.ShapeDtypeStruct((num_steps, B_pad, OUT_PAD), jnp.float32),   # membranes
    )
    out_spec = pl.BlockSpec((num_steps, TB, OUT_PAD), lambda i: (0, i, 0))

    # Weights/biases use a constant index_map so they stay VMEM-resident across
    # batch tiles; the ~0.8 MB cost of their second pipeline buffer is irrelevant
    # at this footprint, so we do not force single-buffering.
    spk_rec, mem_rec = pl.pallas_call(
        _snn_kernel,
        out_shape=out_shape,
        grid=(B_pad // TB,),
        in_specs=[
            pl.BlockSpec((TB, IN_DIM), lambda i: (i, 0)),           # int8 spike times (batch tile)
            pl.BlockSpec((IN_DIM, HID_PAD), lambda i: (0, 0)),      # w1 (resident)
            pl.BlockSpec((1, HID_PAD), lambda i: (0, 0)),           # b1 (resident)
            pl.BlockSpec((HID_PAD, OUT_PAD), lambda i: (0, 0)),     # w2 (resident)
            pl.BlockSpec((1, OUT_PAD), lambda i: (0, 0)),           # b2 (resident)
        ],
        out_specs=(out_spec, out_spec),
        compiler_params=pltpu.CompilerParams(
            dimension_semantics=("parallel",),                      # megacore / dual-TC split
            vmem_limit_bytes=32 * 1024 * 1024),                     # v5e default is 16 MiB
    )(spike_time, w1_p, b1_p, w2_p, b2_p)

    if not slice_output:
        return spk_rec, mem_rec
    return (spk_rec[:, :B, :OUT_DIM].astype(jnp.float32),
            mem_rec[:, :B, :OUT_DIM])


def init_params(key):
    """Deterministic PyTorch-Linear-style init (uniform(-1/sqrt(fan_in), +))."""
    k1, k2, k3, k4 = jax.random.split(key, 4)
    lim1 = 1.0 / np.sqrt(IN_DIM)
    w1 = jax.random.uniform(k1, (HID_DIM, IN_DIM), jnp.float32, -lim1, lim1)
    b1 = jax.random.uniform(k2, (HID_DIM,), jnp.float32, -lim1, lim1)
    lim2 = 1.0 / np.sqrt(HID_DIM)
    w2 = jax.random.uniform(k3, (OUT_DIM, HID_DIM), jnp.float32, -lim2, lim2)
    b2 = jax.random.uniform(k4, (OUT_DIM,), jnp.float32, -lim2, lim2)
    return w1, b1, w2, b2


def reference_forward(x, w1, b1, w2, b2, num_steps=NUM_STEPS):
    """Pure-JAX reference mirroring the PyTorch semantics (f32, unpadded)."""
    B = x.shape[0]
    xf = x.reshape(B, -1).astype(jnp.float32)
    inv = 1.0 / (xf.max() - xf.min())
    xr = (xf - xf.min()) * inv
    tau = (num_steps - 1) / (1.0 - ENC_THRESHOLD)
    st = jnp.round(jnp.minimum(tau * (1.0 - xr), float(num_steps - 1)))
    mem1 = jnp.zeros((B, HID_DIM), jnp.float32)
    mem2 = jnp.zeros((B, OUT_DIM), jnp.float32)
    spks, mems = [], []
    for step in range(num_steps):
        inp = (st == float(step)).astype(jnp.float32)
        cur1 = inp @ w1.T + b1
        reset1 = (mem1 > THRESHOLD).astype(jnp.float32)
        mem1 = BETA * mem1 + cur1 - reset1 * THRESHOLD
        spk1 = (mem1 > THRESHOLD).astype(jnp.float32)
        cur2 = spk1 @ w2.T + b2
        reset2 = (mem2 > THRESHOLD).astype(jnp.float32)
        mem2 = BETA * mem2 + cur2 - reset2 * THRESHOLD
        spk2 = (mem2 > THRESHOLD).astype(jnp.float32)
        spks.append(spk2)
        mems.append(mem2)
    return jnp.stack(spks), jnp.stack(mems)


if __name__ == "__main__":
    key = jax.random.PRNGKey(0)
    kx, kp = jax.random.split(key)
    # Small MNIST-like input consistent with fc1's 784 input features.
    x = jax.random.uniform(kx, (8, 1, 28, 28), dtype=jnp.float32)
    w1, b1, w2, b2 = init_params(kp)

    spk, mem = spiking_network_forward(x, w1, b1, w2, b2)
    jax.block_until_ready((spk, mem))

    # Tolerance note: the kernel multiplies with bf16 weights (MXU-native), so the
    # reference uses the same bf16-quantized weights; this is the only precision
    # change vs the f32 PyTorch module.
    w1_q = w1.astype(jnp.bfloat16).astype(jnp.float32)
    w2_q = w2.astype(jnp.bfloat16).astype(jnp.float32)
    spk_ref, mem_ref = reference_forward(x, w1_q, b1, w2_q, b2)

    np.testing.assert_allclose(np.asarray(mem), np.asarray(mem_ref), rtol=1e-4, atol=1e-4)
    np.testing.assert_allclose(np.asarray(spk), np.asarray(spk_ref), atol=1e-4)

    print("KERNEL_OK")
</pallas_src>

<mosaic_0001>
module attributes {stable_mosaic.version = 11 : i64} {
  func.func @_snn_kernel(%arg0: i32, %arg1: memref<32x784xi8, #tpu.memory_space<vmem>>, %arg2: memref<784x256xbf16, #tpu.memory_space<vmem>>, %arg3: memref<1x256xf32, #tpu.memory_space<vmem>>, %arg4: memref<256x128xbf16, #tpu.memory_space<vmem>>, %arg5: memref<1x128xf32, #tpu.memory_space<vmem>>, %arg6: memref<5x32x128xbf16, #tpu.memory_space<vmem>>, %arg7: memref<5x32x128xf32, #tpu.memory_space<vmem>>) attributes {dimension_semantics = [#tpu.dimension_semantics<parallel>], iteration_bounds = array<i64: 1>, scalar_prefetch = 0 : i64, scratch_operands = 0 : i64, tpu.core_type = #tpu.core_type<tc>, window_params = [{transform_indices = @transform_0, window_bounds = array<i64: 32, 784>}, {pipeline_mode = #tpu.pipeline_mode<synchronous>, transform_indices = @transform_1, window_bounds = array<i64: 784, 256>}, {pipeline_mode = #tpu.pipeline_mode<synchronous>, transform_indices = @transform_2, window_bounds = array<i64: 1, 256>}, {pipeline_mode = #tpu.pipeline_mode<synchronous>, transform_indices = @transform_3, window_bounds = array<i64: 256, 128>}, {pipeline_mode = #tpu.pipeline_mode<synchronous>, transform_indices = @transform_4, window_bounds = array<i64: 1, 128>}, {transform_indices = @transform_5, window_bounds = array<i64: 5, 32, 128>}, {transform_indices = @transform_6, window_bounds = array<i64: 5, 32, 128>}]} {
    %c0 = arith.constant 0 : index
    %c0_0 = arith.constant 0 : index
    %0 = vector.load %arg1[%c0, %c0_0] : memref<32x784xi8, #tpu.memory_space<vmem>>, vector<32x784xi8>
    %1 = arith.extsi %0 : vector<32x784xi8> to vector<32x784xi32>
    %2 = tpu.iota {dimensions = array<i32: 0>} : vector<5x32x784xi32>
    %3 = vector.shape_cast %1 : vector<32x784xi32> to vector<1x32x784xi32>
    %4 = vector.broadcast %3 : vector<1x32x784xi32> to vector<5x32x784xi32>
    %5 = arith.cmpi eq, %4, %2 : vector<5x32x784xi32>
    %6 = arith.extui %5 : vector<5x32x784xi1> to vector<5x32x784xi32>
    %7 = arith.sitofp %6 : vector<5x32x784xi32> to vector<5x32x784xf32>
    %8 = arith.truncf %7 : vector<5x32x784xf32> to vector<5x32x784xbf16>
    %9 = vector.shape_cast %8 : vector<5x32x784xbf16> to vector<160x784xbf16>
    %c0_1 = arith.constant 0 : index
    %c0_2 = arith.constant 0 : index
    %10 = vector.load %arg2[%c0_1, %c0_2] : memref<784x256xbf16, #tpu.memory_space<vmem>>, vector<784x256xbf16>
    %c0_3 = arith.constant 0 : index
    %c0_4 = arith.constant 0 : index
    %11 = vector.load %arg4[%c0_3, %c0_4] : memref<256x128xbf16, #tpu.memory_space<vmem>>, vector<256x128xbf16>
    %cst = arith.constant dense<0.000000e+00> : vector<160x256xf32>
    %12 = tpu.matmul %9, %10, %cst {dimension_numbers = #tpu.dot_dimension_numbers<[1], [0], [0], [1], [0, 0, 1, 1], [], []>} : vector<160x784xbf16>, vector<784x256xbf16>, vector<160x256xf32> -> vector<160x256xf32>
    %c0_5 = arith.constant 0 : index
    %c0_6 = arith.constant 0 : index
    %13 = vector.load %arg3[%c0_5, %c0_6] : memref<1x256xf32, #tpu.memory_space<vmem>>, vector<1x256xf32>
    %14 = vector.broadcast %13 : vector<1x256xf32> to vector<160x256xf32>
    %15 = arith.addf %12, %14 : vector<160x256xf32>
    %c0_7 = arith.constant 0 : index
    %c0_8 = arith.constant 0 : index
    %16 = vector.load %arg5[%c0_7, %c0_8] : memref<1x128xf32, #tpu.memory_space<vmem>>, vector<1x128xf32>
    %17 = vector.shape_cast %16 : vector<1x128xf32> to vector<1x128xf32>
    %18 = vector.broadcast %17 : vector<1x128xf32> to vector<32x128xf32>
    %cst_9 = arith.constant 0.000000e+00 : f32
    %19 = vector.broadcast %cst_9 : f32 to vector<32x256xf32>
    %cst_10 = arith.constant 0.000000e+00 : f32
    %20 = vector.broadcast %cst_10 : f32 to vector<32x128xf32>
    %21 = vector.extract_strided_slice %15 {offsets = [0, 0], sizes = [32, 256], strides = [1, 1]} : vector<160x256xf32> to vector<32x256xf32>
    %cst_11 = arith.constant 1.000000e+00 : f32
    %22 = vector.broadcast %cst_11 : f32 to vector<32x256xf32>
    %23 = arith.cmpf ogt, %19, %22 : vector<32x256xf32>
    %cst_12 = arith.constant 1.000000e+00 : f32
    %cst_13 = arith.constant 0.000000e+00 : f32
    %24 = vector.broadcast %cst_12 : f32 to vector<32x256xf32>
    %25 = vector.broadcast %cst_13 : f32 to vector<32x256xf32>
    %26 = arith.select %23, %24, %25 : vector<32x256xi1>, vector<32x256xf32>
    %cst_14 = arith.constant 0.899999976 : f32
    %27 = vector.broadcast %cst_14 : f32 to vector<32x256xf32>
    %28 = arith.mulf %27, %19 : vector<32x256xf32>
    %29 = arith.addf %28, %21 : vector<32x256xf32>
    %30 = arith.subf %29, %26 : vector<32x256xf32>
    %cst_15 = arith.constant 1.000000e+00 : f32
    %31 = vector.broadcast %cst_15 : f32 to vector<32x256xf32>
    %32 = arith.cmpf ogt, %30, %31 : vector<32x256xf32>
    %33 = arith.extui %32 : vector<32x256xi1> to vector<32x256xi32>
    %34 = arith.sitofp %33 : vector<32x256xi32> to vector<32x256xf32>
    %35 = arith.truncf %34 : vector<32x256xf32> to vector<32x256xbf16>
    %cst_16 = arith.constant dense<0.000000e+00> : vector<32x128xf32>
    %36 = tpu.matmul %35, %11, %cst_16 {dimension_numbers = #tpu.dot_dimension_numbers<[1], [0], [0], [1], [0, 0, 1, 1], [], []>} : vector<32x256xbf16>, vector<256x128xbf16>, vector<32x128xf32> -> vector<32x128xf32>
    %37 = arith.addf %36, %18 : vector<32x128xf32>
    %cst_17 = arith.constant 1.000000e+00 : f32
    %38 = vector.broadcast %cst_17 : f32 to vector<32x128xf32>
    %39 = arith.cmpf ogt, %20, %38 : vector<32x128xf32>
    %cst_18 = arith.constant 1.000000e+00 : f32
    %cst_19 = arith.constant 0.000000e+00 : f32
    %40 = vector.broadcast %cst_18 : f32 to vector<32x128xf32>
    %41 = vector.broadcast %cst_19 : f32 to vector<32x128xf32>
    %42 = arith.select %39, %40, %41 : vector<32x128xi1>, vector<32x128xf32>
    %cst_20 = arith.constant 0.899999976 : f32
    %43 = vector.broadcast %cst_20 : f32 to vector<32x128xf32>
    %44 = arith.mulf %43, %20 : vector<32x128xf32>
    %45 = arith.addf %44, %37 : vector<32x128xf32>
    %46 = arith.subf %45, %42 : vector<32x128xf32>
    %cst_21 = arith.constant 1.000000e+00 : f32
    %47 = vector.broadcast %cst_21 : f32 to vector<32x128xf32>
    %48 = arith.cmpf ogt, %46, %47 : vector<32x128xf32>
    %49 = arith.extui %48 : vector<32x128xi1> to vector<32x128xi32>
    %50 = arith.sitofp %49 : vector<32x128xi32> to vector<32x128xf32>
    %51 = arith.truncf %50 : vector<32x128xf32> to vector<32x128xbf16>
    %c0_22 = arith.constant 0 : index
    %c0_23 = arith.constant 0 : index
    %c0_24 = arith.constant 0 : index
    %52 = vector.load %arg6[%c0_22, %c0_23, %c0_24] : memref<5x32x128xbf16, #tpu.memory_space<vmem>>, vector<1x32x128xbf16>
    %53 = vector.shape_cast %52 : vector<1x32x128xbf16> to vector<32x128xbf16>
    %54 = vector.shape_cast %51 : vector<32x128xbf16> to vector<1x32x128xbf16>
    tpu.vector_store %arg6[%c0_22, %c0_23, %c0_24], %54 {strides = array<i32>} : memref<5x32x128xbf16, #tpu.memory_space<vmem>>, vector<1x32x128xbf16>,
    %c0_25 = arith.constant 0 : index
    %c0_26 = arith.constant 0 : index
    %c0_27 = arith.constant 0 : index
    %55 = vector.load %arg7[%c0_25, %c0_26, %c0_27] : memref<5x32x128xf32, #tpu.memory_space<vmem>>, vector<1x32x128xf32>
    %56 = vector.shape_cast %55 : vector<1x32x128xf32> to vector<32x128xf32>
    %57 = vector.shape_cast %46 : vector<32x128xf32> to vector<1x32x128xf32>
    tpu.vector_store %arg7[%c0_25, %c0_26, %c0_27], %57 {strides = array<i32>} : memref<5x32x128xf32, #tpu.memory_space<vmem>>, vector<1x32x128xf32>,
    %58 = vector.extract_strided_slice %15 {offsets = [32, 0], sizes = [32, 256], strides = [1, 1]} : vector<160x256xf32> to vector<32x256xf32>
    %cst_28 = arith.constant 1.000000e+00 : f32
    %59 = vector.broadcast %cst_28 : f32 to vector<32x256xf32>
    %60 = arith.cmpf ogt, %30, %59 : vector<32x256xf32>
    %cst_29 = arith.constant 1.000000e+00 : f32
    %cst_30 = arith.constant 0.000000e+00 : f32
    %61 = vector.broadcast %cst_29 : f32 to vector<32x256xf32>
    %62 = vector.broadcast %cst_30 : f32 to vector<32x256xf32>
    %63 = arith.select %60, %61, %62 : vector<32x256xi1>, vector<32x256xf32>
    %cst_31 = arith.constant 0.899999976 : f32
    %64 = vector.broadcast %cst_31 : f32 to vector<32x256xf32>
    %65 = arith.mulf %64, %30 : vector<32x256xf32>
    %66 = arith.addf %65, %58 : vector<32x256xf32>
    %67 = arith.subf %66, %63 : vector<32x256xf32>
    %cst_32 = arith.constant 1.000000e+00 : f32
    %68 = vector.broadcast %cst_32 : f32 to vector<32x256xf32>
    %69 = arith.cmpf ogt, %67, %68 : vector<32x256xf32>
    %70 = arith.extui %69 : vector<32x256xi1> to vector<32x256xi32>
    %71 = arith.sitofp %70 : vector<32x256xi32> to vector<32x256xf32>
    %72 = arith.truncf %71 : vector<32x256xf32> to vector<32x256xbf16>
    %cst_33 = arith.constant dense<0.000000e+00> : vector<32x128xf32>
    %73 = tpu.matmul %72, %11, %cst_33 {dimension_numbers = #tpu.dot_dimension_numbers<[1], [0], [0], [1], [0, 0, 1, 1], [], []>} : vector<32x256xbf16>, vector<256x128xbf16>, vector<32x128xf32> -> vector<32x128xf32>
    %74 = arith.addf %73, %18 : vector<32x128xf32>
    %cst_34 = arith.constant 1.000000e+00 : f32
    %75 = vector.broadcast %cst_34 : f32 to vector<32x128xf32>
    %76 = arith.cmpf ogt, %46, %75 : vector<32x128xf32>
    %cst_35 = arith.constant 1.000000e+00 : f32
    %cst_36 = arith.constant 0.000000e+00 : f32
    %77 = vector.broadcast %cst_35 : f32 to vector<32x128xf32>
    %78 = vector.broadcast %cst_36 : f32 to vector<32x128xf32>
    %79 = arith.select %76, %77, %78 : vector<32x128xi1>, vector<32x128xf32>
    %cst_37 = arith.constant 0.899999976 : f32
    %80 = vector.broadcast %cst_37 : f32 to vector<32x128xf32>
    %81 = arith.mulf %80, %46 : vector<32x128xf32>
    %82 = arith.addf %81, %74 : vector<32x128xf32>
    %83 = arith.subf %82, %79 : vector<32x128xf32>
    %cst_38 = arith.constant 1.000000e+00 : f32
    %84 = vector.broadcast %cst_38 : f32 to vector<32x128xf32>
    %85 = arith.cmpf ogt, %83, %84 : vector<32x128xf32>
    %86 = arith.extui %85 : vector<32x128xi1> to vector<32x128xi32>
    %87 = arith.sitofp %86 : vector<32x128xi32> to vector<32x128xf32>
    %88 = arith.truncf %87 : vector<32x128xf32> to vector<32x128xbf16>
    %c1 = arith.constant 1 : index
    %c0_39 = arith.constant 0 : index
    %c0_40 = arith.constant 0 : index
    %89 = vector.load %arg6[%c1, %c0_39, %c0_40] : memref<5x32x128xbf16, #tpu.memory_space<vmem>>, vector<1x32x128xbf16>
    %90 = vector.shape_cast %89 : vector<1x32x128xbf16> to vector<32x128xbf16>
    %91 = vector.shape_cast %88 : vector<32x128xbf16> to vector<1x32x128xbf16>
    tpu.vector_store %arg6[%c1, %c0_39, %c0_40], %91 {strides = array<i32>} : memref<5x32x128xbf16, #tpu.memory_space<vmem>>, vector<1x32x128xbf16>,
    %c1_41 = arith.constant 1 : index
    %c0_42 = arith.constant 0 : index
    %c0_43 = arith.constant 0 : index
    %92 = vector.load %arg7[%c1_41, %c0_42, %c0_43] : memref<5x32x128xf32, #tpu.memory_space<vmem>>, vector<1x32x128xf32>
    %93 = vector.shape_cast %92 : vector<1x32x128xf32> to vector<32x128xf32>
    %94 = vector.shape_cast %83 : vector<32x128xf32> to vector<1x32x128xf32>
    tpu.vector_store %arg7[%c1_41, %c0_42, %c0_43], %94 {strides = array<i32>} : memref<5x32x128xf32, #tpu.memory_space<vmem>>, vector<1x32x128xf32>,
    %95 = vector.extract_strided_slice %15 {offsets = [64, 0], sizes = [32, 256], strides = [1, 1]} : vector<160x256xf32> to vector<32x256xf32>
    %cst_44 = arith.constant 1.000000e+00 : f32
    %96 = vector.broadcast %cst_44 : f32 to vector<32x256xf32>
    %97 = arith.cmpf ogt, %67, %96 : vector<32x256xf32>
    %cst_45 = arith.constant 1.000000e+00 : f32
    %cst_46 = arith.constant 0.000000e+00 : f32
    %98 = vector.broadcast %cst_45 : f32 to vector<32x256xf32>
    %99 = vector.broadcast %cst_46 : f32 to vector<32x256xf32>
    %100 = arith.select %97, %98, %99 : vector<32x256xi1>, vector<32x256xf32>
    %cst_47 = arith.constant 0.899999976 : f32
    %101 = vector.broadcast %cst_47 : f32 to vector<32x256xf32>
    %102 = arith.mulf %101, %67 : vector<32x256xf32>
    %103 = arith.addf %102, %95 : vector<32x256xf32>
    %104 = arith.subf %103, %100 : vector<32x256xf32>
    %cst_48 = arith.constant 1.000000e+00 : f32
    %105 = vector.broadcast %cst_48 : f32 to vector<32x256xf32>
    %106 = arith.cmpf ogt, %104, %105 : vector<32x256xf32>
    %107 = arith.extui %106 : vector<32x256xi1> to vector<32x256xi32>
    %108 = arith.sitofp %107 : vector<32x256xi32> to vector<32x256xf32>
    %109 = arith.truncf %108 : vector<32x256xf32> to vector<32x256xbf16>
    %cst_49 = arith.constant dense<0.000000e+00> : vector<32x128xf32>
    %110 = tpu.matmul %109, %11, %cst_49 {dimension_numbers = #tpu.dot_dimension_numbers<[1], [0], [0], [1], [0, 0, 1, 1], [], []>} : vector<32x256xbf16>, vector<256x128xbf16>, vector<32x128xf32> -> vector<32x128xf32>
    %111 = arith.addf %110, %18 : vector<32x128xf32>
    %cst_50 = arith.constant 1.000000e+00 : f32
    %112 = vector.broadcast %cst_50 : f32 to vector<32x128xf32>
    %113 = arith.cmpf ogt, %83, %112 : vector<32x128xf32>
    %cst_51 = arith.constant 1.000000e+00 : f32
    %cst_52 = arith.constant 0.000000e+00 : f32
    %114 = vector.broadcast %cst_51 : f32 to vector<32x128xf32>
    %115 = vector.broadcast %cst_52 : f32 to vector<32x128xf32>
    %116 = arith.select %113, %114, %115 : vector<32x128xi1>, vector<32x128xf32>
    %cst_53 = arith.constant 0.899999976 : f32
    %117 = vector.broadcast %cst_53 : f32 to vector<32x128xf32>
    %118 = arith.mulf %117, %83 : vector<32x128xf32>
    %119 = arith.addf %118, %111 : vector<32x128xf32>
    %120 = arith.subf %119, %116 : vector<32x128xf32>
    %cst_54 = arith.constant 1.000000e+00 : f32
    %121 = vector.broadcast %cst_54 : f32 to vector<32x128xf32>
    %122 = arith.cmpf ogt, %120, %121 : vector<32x128xf32>
    %123 = arith.extui %122 : vector<32x128xi1> to vector<32x128xi32>
    %124 = arith.sitofp %123 : vector<32x128xi32> to vector<32x128xf32>
    %125 = arith.truncf %124 : vector<32x128xf32> to vector<32x128xbf16>
    %c2 = arith.constant 2 : index
    %c0_55 = arith.constant 0 : index
    %c0_56 = arith.constant 0 : index
    %126 = vector.load %arg6[%c2, %c0_55, %c0_56] : memref<5x32x128xbf16, #tpu.memory_space<vmem>>, vector<1x32x128xbf16>
    %127 = vector.shape_cast %126 : vector<1x32x128xbf16> to vector<32x128xbf16>
    %128 = vector.shape_cast %125 : vector<32x128xbf16> to vector<1x32x128xbf16>
    tpu.vector_store %arg6[%c2, %c0_55, %c0_56], %128 {strides = array<i32>} : memref<5x32x128xbf16, #tpu.memory_space<vmem>>, vector<1x32x128xbf16>,
    %c2_57 = arith.constant 2 : index
    %c0_58 = arith.constant 0 : index
    %c0_59 = arith.constant 0 : index
    %129 = vector.load %arg7[%c2_57, %c0_58, %c0_59] : memref<5x32x128xf32, #tpu.memory_space<vmem>>, vector<1x32x128xf32>
    %130 = vector.shape_cast %129 : vector<1x32x128xf32> to vector<32x128xf32>
    %131 = vector.shape_cast %120 : vector<32x128xf32> to vector<1x32x128xf32>
    tpu.vector_store %arg7[%c2_57, %c0_58, %c0_59], %131 {strides = array<i32>} : memref<5x32x128xf32, #tpu.memory_space<vmem>>, vector<1x32x128xf32>,
    %132 = vector.extract_strided_slice %15 {offsets = [96, 0], sizes = [32, 256], strides = [1, 1]} : vector<160x256xf32> to vector<32x256xf32>
    %cst_60 = arith.constant 1.000000e+00 : f32
    %133 = vector.broadcast %cst_60 : f32 to vector<32x256xf32>
    %134 = arith.cmpf ogt, %104, %133 : vector<32x256xf32>
    %cst_61 = arith.constant 1.000000e+00 : f32
    %cst_62 = arith.constant 0.000000e+00 : f32
    %135 = vector.broadcast %cst_61 : f32 to vector<32x256xf32>
    %136 = vector.broadcast %cst_62 : f32 to vector<32x256xf32>
    %137 = arith.select %134, %135, %136 : vector<32x256xi1>, vector<32x256xf32>
    %cst_63 = arith.constant 0.899999976 : f32
    %138 = vector.broadcast %cst_63 : f32 to vector<32x256xf32>
    %139 = arith.mulf %138, %104 : vector<32x256xf32>
    %140 = arith.addf %139, %132 : vector<32x256xf32>
    %141 = arith.subf %140, %137 : vector<32x256xf32>
    %cst_64 = arith.constant 1.000000e+00 : f32
    %142 = vector.broadcast %cst_64 : f32 to vector<32x256xf32>
    %143 = arith.cmpf ogt, %141, %142 : vector<32x256xf32>
    %144 = arith.extui %143 : vector<32x256xi1> to vector<32x256xi32>
    %145 = arith.sitofp %144 : vector<32x256xi32> to vector<32x256xf32>
    %146 = arith.truncf %145 : vector<32x256xf32> to vector<32x256xbf16>
    %cst_65 = arith.constant dense<0.000000e+00> : vector<32x128xf32>
    %147 = tpu.matmul %146, %11, %cst_65 {dimension_numbers = #tpu.dot_dimension_numbers<[1], [0], [0], [1], [0, 0, 1, 1], [], []>} : vector<32x256xbf16>, vector<256x128xbf16>, vector<32x128xf32> -> vector<32x128xf32>
    %148 = arith.addf %147, %18 : vector<32x128xf32>
    %cst_66 = arith.constant 1.000000e+00 : f32
    %149 = vector.broadcast %cst_66 : f32 to vector<32x128xf32>
    %150 = arith.cmpf ogt, %120, %149 : vector<32x128xf32>
    %cst_67 = arith.constant 1.000000e+00 : f32
    %cst_68 = arith.constant 0.000000e+00 : f32
    %151 = vector.broadcast %cst_67 : f32 to vector<32x128xf32>
    %152 = vector.broadcast %cst_68 : f32 to vector<32x128xf32>
    %153 = arith.select %150, %151, %152 : vector<32x128xi1>, vector<32x128xf32>
    %cst_69 = arith.constant 0.899999976 : f32
    %154 = vector.broadcast %cst_69 : f32 to vector<32x128xf32>
    %155 = arith.mulf %154, %120 : vector<32x128xf32>
    %156 = arith.addf %155, %148 : vector<32x128xf32>
    %157 = arith.subf %156, %153 : vector<32x128xf32>
    %cst_70 = arith.constant 1.000000e+00 : f32
    %158 = vector.broadcast %cst_70 : f32 to vector<32x128xf32>
    %159 = arith.cmpf ogt, %157, %158 : vector<32x128xf32>
    %160 = arith.extui %159 : vector<32x128xi1> to vector<32x128xi32>
    %161 = arith.sitofp %160 : vector<32x128xi32> to vector<32x128xf32>
    %162 = arith.truncf %161 : vector<32x128xf32> to vector<32x128xbf16>
    %c3 = arith.constant 3 : index
    %c0_71 = arith.constant 0 : index
    %c0_72 = arith.constant 0 : index
    %163 = vector.load %arg6[%c3, %c0_71, %c0_72] : memref<5x32x128xbf16, #tpu.memory_space<vmem>>, vector<1x32x128xbf16>
    %164 = vector.shape_cast %163 : vector<1x32x128xbf16> to vector<32x128xbf16>
    %165 = vector.shape_cast %162 : vector<32x128xbf16> to vector<1x32x128xbf16>
    tpu.vector_store %arg6[%c3, %c0_71, %c0_72], %165 {strides = array<i32>} : memref<5x32x128xbf16, #tpu.memory_space<vmem>>, vector<1x32x128xbf16>,
    %c3_73 = arith.constant 3 : index
    %c0_74 = arith.constant 0 : index
    %c0_75 = arith.constant 0 : index
    %166 = vector.load %arg7[%c3_73, %c0_74, %c0_75] : memref<5x32x128xf32, #tpu.memory_space<vmem>>, vector<1x32x128xf32>
    %167 = vector.shape_cast %166 : vector<1x32x128xf32> to vector<32x128xf32>
    %168 = vector.shape_cast %157 : vector<32x128xf32> to vector<1x32x128xf32>
    tpu.vector_store %arg7[%c3_73, %c0_74, %c0_75], %168 {strides = array<i32>} : memref<5x32x128xf32, #tpu.memory_space<vmem>>, vector<1x32x128xf32>,
    %169 = vector.extract_strided_slice %15 {offsets = [128, 0], sizes = [32, 256], strides = [1, 1]} : vector<160x256xf32> to vector<32x256xf32>
    %cst_76 = arith.constant 1.000000e+00 : f32
    %170 = vector.broadcast %cst_76 : f32 to vector<32x256xf32>
    %171 = arith.cmpf ogt, %141, %170 : vector<32x256xf32>
    %cst_77 = arith.constant 1.000000e+00 : f32
    %cst_78 = arith.constant 0.000000e+00 : f32
    %172 = vector.broadcast %cst_77 : f32 to vector<32x256xf32>
    %173 = vector.broadcast %cst_78 : f32 to vector<32x256xf32>
    %174 = arith.select %171, %172, %173 : vector<32x256xi1>, vector<32x256xf32>
    %cst_79 = arith.constant 0.899999976 : f32
    %175 = vector.broadcast %cst_79 : f32 to vector<32x256xf32>
    %176 = arith.mulf %175, %141 : vector<32x256xf32>
    %177 = arith.addf %176, %169 : vector<32x256xf32>
    %178 = arith.subf %177, %174 : vector<32x256xf32>
    %cst_80 = arith.constant 1.000000e+00 : f32
    %179 = vector.broadcast %cst_80 : f32 to vector<32x256xf32>
    %180 = arith.cmpf ogt, %178, %179 : vector<32x256xf32>
    %181 = arith.extui %180 : vector<32x256xi1> to vector<32x256xi32>
    %182 = arith.sitofp %181 : vector<32x256xi32> to vector<32x256xf32>
    %183 = arith.truncf %182 : vector<32x256xf32> to vector<32x256xbf16>
    %cst_81 = arith.constant dense<0.000000e+00> : vector<32x128xf32>
    %184 = tpu.matmul %183, %11, %cst_81 {dimension_numbers = #tpu.dot_dimension_numbers<[1], [0], [0], [1], [0, 0, 1, 1], [], []>} : vector<32x256xbf16>, vector<256x128xbf16>, vector<32x128xf32> -> vector<32x128xf32>
    %185 = arith.addf %184, %18 : vector<32x128xf32>
    %cst_82 = arith.constant 1.000000e+00 : f32
    %186 = vector.broadcast %cst_82 : f32 to vector<32x128xf32>
    %187 = arith.cmpf ogt, %157, %186 : vector<32x128xf32>
    %cst_83 = arith.constant 1.000000e+00 : f32
    %cst_84 = arith.constant 0.000000e+00 : f32
    %188 = vector.broadcast %cst_83 : f32 to vector<32x128xf32>
    %189 = vector.broadcast %cst_84 : f32 to vector<32x128xf32>
    %190 = arith.select %187, %188, %189 : vector<32x128xi1>, vector<32x128xf32>
    %cst_85 = arith.constant 0.899999976 : f32
    %191 = vector.broadcast %cst_85 : f32 to vector<32x128xf32>
    %192 = arith.mulf %191, %157 : vector<32x128xf32>
    %193 = arith.addf %192, %185 : vector<32x128xf32>
    %194 = arith.subf %193, %190 : vector<32x128xf32>
    %cst_86 = arith.constant 1.000000e+00 : f32
    %195 = vector.broadcast %cst_86 : f32 to vector<32x128xf32>
    %196 = arith.cmpf ogt, %194, %195 : vector<32x128xf32>
    %197 = arith.extui %196 : vector<32x128xi1> to vector<32x128xi32>
    %198 = arith.sitofp %197 : vector<32x128xi32> to vector<32x128xf32>
    %199 = arith.truncf %198 : vector<32x128xf32> to vector<32x128xbf16>
    %c4 = arith.constant 4 : index
    %c0_87 = arith.constant 0 : index
    %c0_88 = arith.constant 0 : index
    %200 = vector.load %arg6[%c4, %c0_87, %c0_88] : memref<5x32x128xbf16, #tpu.memory_space<vmem>>, vector<1x32x128xbf16>
    %201 = vector.shape_cast %200 : vector<1x32x128xbf16> to vector<32x128xbf16>
    %202 = vector.shape_cast %199 : vector<32x128xbf16> to vector<1x32x128xbf16>
    tpu.vector_store %arg6[%c4, %c0_87, %c0_88], %202 {strides = array<i32>} : memref<5x32x128xbf16, #tpu.memory_space<vmem>>, vector<1x32x128xbf16>,
    %c4_89 = arith.constant 4 : index
    %c0_90 = arith.constant 0 : index
    %c0_91 = arith.constant 0 : index
    %203 = vector.load %arg7[%c4_89, %c0_90, %c0_91] : memref<5x32x128xf32, #tpu.memory_space<vmem>>, vector<1x32x128xf32>
    %204 = vector.shape_cast %203 : vector<1x32x128xf32> to vector<32x128xf32>
    %205 = vector.shape_cast %194 : vector<32x128xf32> to vector<1x32x128xf32>
    tpu.vector_store %arg7[%c4_89, %c0_90, %c0_91], %205 {strides = array<i32>} : memref<5x32x128xf32, #tpu.memory_space<vmem>>, vector<1x32x128xf32>,
    return
  }
  func.func @transform_0(%arg0: i32) -> (i32, i32) {
    %c0_i32 = arith.constant 0 : i32
    %c0_i32_0 = arith.constant 0 : i32
    return %arg0, %c0_i32 : i32, i32
  }
  func.func @transform_1(%arg0: i32) -> (i32, i32) {
    %c0_i32 = arith.constant 0 : i32
    %c0_i32_0 = arith.constant 0 : i32
    %c0_i32_1 = arith.constant 0 : i32
    return %c0_i32, %c0_i32_0 : i32, i32
  }
  func.func @transform_2(%arg0: i32) -> (i32, i32) {
    %c0_i32 = arith.constant 0 : i32
    %c0_i32_0 = arith.constant 0 : i32
    %c0_i32_1 = arith.constant 0 : i32
    return %c0_i32, %c0_i32_0 : i32, i32
  }
  func.func @transform_3(%arg0: i32) -> (i32, i32) {
    %c0_i32 = arith.constant 0 : i32
    %c0_i32_0 = arith.constant 0 : i32
    %c0_i32_1 = arith.constant 0 : i32
    return %c0_i32, %c0_i32_0 : i32, i32
  }
  func.func @transform_4(%arg0: i32) -> (i32, i32) {
    %c0_i32 = arith.constant 0 : i32
    %c0_i32_0 = arith.constant 0 : i32
    %c0_i32_1 = arith.constant 0 : i32
    return %c0_i32, %c0_i32_0 : i32, i32
  }
  func.func @transform_5(%arg0: i32) -> (i32, i32, i32) {
    %c0_i32 = arith.constant 0 : i32
    %c0_i32_0 = arith.constant 0 : i32
    %c0_i32_1 = arith.constant 0 : i32
    return %c0_i32, %arg0, %c0_i32_0 : i32, i32, i32
  }
  func.func @transform_6(%arg0: i32) -> (i32, i32, i32) {
    %c0_i32 = arith.constant 0 : i32
    %c0_i32_0 = arith.constant 0 : i32
    %c0_i32_1 = arith.constant 0 : i32
    return %c0_i32, %arg0, %c0_i32_0 : i32, i32, i32
  }
}

</mosaic_0001>

<bundles_post_ra>
// kernel: tpu_custom_call.1
= control target key start
LH: loop header
LB: loop body
LE: loop exit
PB: predicated region body
PF: predicated region fallthrough
CT: control target
= control target key end

     0   :  { %12 = vsyncpa [#allocation3], 0  ;;  %s5002_s0 = inlined_call_operand.hbm [shape: s8[32,784], index: 0, kind: input, shape index: {}]   ;;  %s5003_s1 = inlined_call_operand.hbm [shape: bf16[784,256], index: 1, kind: input, shape index: {}]   ;;  %s5004_s2 = inlined_call_operand.vmem [shape: f32[1,256], index: 2, kind: input, shape index: {}]   ;;  %s5005_s3 = inlined_call_operand.hbm [shape: bf16[256,128], index: 3, kind: input, shape index: {}]   ;;  %s5006_s4 = inlined_call_operand.vmem [shape: f32[1,128], index: 4, kind: input, shape index: {}]   ;;  %s5007_s5 = inlined_call_operand.hbm [shape: bf16[5,32,128], index: 5, kind: output, shape index: {0}]   ;;  %s5008_s6 = inlined_call_operand.hbm [shape: f32[5,32,128], index: 6, kind: output, shape index: {1}]  }
   0x1   :  { %13 = vsyncpa [#allocation6], 0 }
   0x2   :  { %14 = vsyncpa [#allocation4], 0 }
   0x3   :  { %15 = vsyncpa [#allocation10], 0  ;;  %s3740_s21 = smov [#allocation5]  }
   0x4   :  { %s31_s22 = sshll.u32 %s3740_s21, 4  ;;  %s32_s22 = int_to_ptr.vmem [resolvable:$true] %s31_s22 }
   0x5   :  { %s3640_s23 = scalar_lea.vmem %s32_s22, 12544  ;;  %p3645_p1 = scmp.lt.s32.totalorder %s32_s22, %s32_s22 }
   0x6   :  { %p3641_p0 = scmp.ne.s32.totalorder %s32_s22, %s3640_s23  ;;  %p3646_p2 = scmp.lt.s32.totalorder %s3640_s23, %s3640_s23 }
   0x8   :  { %p3647_p3 = por %p3646_p2, %p3645_p1 }
   0xa   :  { %p3648_p4 = pnand %p3647_p3, %p3641_p0 }
   0xc   :  { %3651 = shalt.err (!%p3648_p4)
}
   0xd   :  { %s3741_s24 = smov 128   ;;  %s3742_s25 = smov 8  }
   0xe   :  { %37 = dma.hbm_to_vmem [thread:$0]  %s5003_s1, 12544, %s32_s22, [#allocation6], %s3741_s24, %s3741_s24, %s3742_s25  }
   0xf   :  { %s3743_s28 = smov [#allocation2]   ;;  %s3744_s30 = smov [#allocation7]  }
  0x10   :  { %s22_s29 = sshll.u32 %s3743_s28, 4  ;;  %s45_s7 = sshll.u32 %s3744_s30, 4  ;;  %s23_s29 = int_to_ptr.vmem [resolvable:$true] %s22_s29  ;;  %s46_s7 = int_to_ptr.vmem [resolvable:$true] %s45_s7 }
  0x11   :  { %s3660_s8 = scalar_lea.vmem %s23_s29, 896  ;;  %p3665_p6 = scmp.lt.s32.totalorder %s23_s29, %s23_s29 }
  0x12   :  { %p3661_p5 = scmp.ne.s32.totalorder %s23_s29, %s3660_s8  ;;  %p3666_p7 = scmp.lt.s32.totalorder %s3660_s8, %s3660_s8 }
  0x14   :  { %p3667_p8 = por %p3666_p7, %p3665_p6 }
  0x16   :  { %p3668_p9 = pnand %p3667_p8, %p3661_p5 }
  0x18   :  { %3671 = shalt.err (!%p3668_p9)
}
  0x19   :  { %25 = dma.hbm_to_vmem [thread:$0]  %s5002_s0, 896, %s23_s29, [#allocation3]  }
  0x1a   :  { %s3680_s11 = scalar_lea.vmem %s46_s7, 2048  ;;  %p3685_p11 = scmp.lt.s32.totalorder %s46_s7, %s46_s7 }
  0x1b   :  { %p3681_p10 = scmp.ne.s32.totalorder %s46_s7, %s3680_s11  ;;  %p3686_p12 = scmp.lt.s32.totalorder %s3680_s11, %s3680_s11 }
  0x1d   :  { %p3687_p13 = por %p3686_p12, %p3685_p11 }
  0x1f   :  { %p3688_p0 = pnand %p3687_p13, %p3681_p10 }
  0x21   :  { %3691 = shalt.err (!%p3688_p0)
}
  0x22   :  { %s3745_s1 = smov 64   ;;  %s3746_s12 = smov 4  }
  0x23   :  { %51 = dma.hbm_to_vmem [thread:$0]  %s5005_s3, 2048, %s46_s7, [#allocation6], %s3745_s1, %s3745_s1, %s3746_s12  }
  0x24   :  { %3732 = dma.done.wait [#allocation3], 896  }
  0x25   :  { %3733 = vsyncadd [#allocation3], 4294966400 }
  0x26   :  { %3734 = dma.done.wait [#allocation6], 14592  }
  0x27   :  { %3735 = vsyncadd [#allocation6], 4294952704  ;;  %v3456_v0 = vld [vmem:[#allocation5 + $0x74] ss:$8 sps:$4 sm:$0xff]   ;;  %v3460_v2 = vld [vmem:[#allocation5 + $0x70] ss:$8 sps:$4 sm:$0xff]  }
  0x28   :  { %v3458_v1 = vld [vmem:[#allocation5 + $0x174] ss:$8 sps:$4 sm:$0xff]   ;;  %1252 = vmatprep.subr.bf16.mxu0 %v3456_v0  ;;  %v3461_v3 = vld [vmem:[#allocation5 + $0x170] ss:$8 sps:$4 sm:$0xff]   ;;  %v3462_v4 = vld [vmem:[#allocation5 + $0x64] ss:$8 sps:$4 sm:$0xff]  }
  0x29   :  { %1385 = vmatprep.subr.bf16.mxu1 %v3458_v1  ;;  %1253 = vmatpush1.bf16.msra.mxu0 %v3460_v2  ;;  %v3464_v5 = vld [vmem:[#allocation5 + $0x164] ss:$8 sps:$4 sm:$0xff]   ;;  %v3466_v6 = vld [vmem:[#allocation5 + $0x60] ss:$8 sps:$4 sm:$0xff]   ;;  %v3468_v8 = vld [vmem:[#allocation5 + $0x54] ss:$8 sps:$4 sm:$0xff]  }
  0x2a   :  { %1386 = vmatpush1.bf16.msra.mxu1 %v3461_v3  ;;  %1254 = vmatprep.subr.bf16.mxu0 %v3462_v4  ;;  %v3467_v7 = vld [vmem:[#allocation5 + $0x160] ss:$8 sps:$4 sm:$0xff]   ;;  %v3470_v9 = vld [vmem:[#allocation5 + $0x154] ss:$8 sps:$4 sm:$0xff]   ;;  %v3472_v10 = vld [vmem:[#allocation5 + $0x50] ss:$8 sps:$4 sm:$0xff]  }
  0x2b   :  { %1387 = vmatprep.subr.bf16.mxu1 %v3464_v5  ;;  %v3473_v11 = vld [vmem:[#allocation5 + $0x150] ss:$8 sps:$4 sm:$0xff]   ;;  %v3474_v12 = vld [vmem:[#allocation5 + $0x44] ss:$8 sps:$4 sm:$0xff]   ;;  %v3478_v14 = vld [vmem:[#allocation5 + $0x40] ss:$8 sps:$4 sm:$0xff]  }
  0x2c   :  { %v3476_v13 = vld [vmem:[#allocation5 + $0x144] ss:$8 sps:$4 sm:$0xff]   ;;  %v3479_v15 = vld [vmem:[#allocation5 + $0x140] ss:$8 sps:$4 sm:$0xff]   ;;  %v3480_v16 = vld [vmem:[#allocation5 + $0x34] ss:$8 sps:$4 sm:$0xff]  }
  0x2d   :  { %1255 = vmatpush1.bf16.msra.mxu0 %v3466_v6  ;;  %v3482_v17 = vld [vmem:[#allocation5 + $0x134] ss:$8 sps:$4 sm:$0xff]   ;;  %v3484_v18 = vld [vmem:[#allocation5 + $0x30] ss:$8 sps:$4 sm:$0xff]   ;;  %v3486_v20 = vld [vmem:[#allocation5 + $0x24] ss:$8 sps:$4 sm:$0xff]  }
  0x2e   :  { %1388 = vmatpush1.bf16.msra.mxu1 %v3467_v7  ;;  %1256 = vmatprep.subr.bf16.mxu0 %v3468_v8  ;;  %v3485_v19 = vld [vmem:[#allocation5 + $0x130] ss:$8 sps:$4 sm:$0xff]   ;;  %v3488_v21 = vld [vmem:[#allocation5 + $0x124] ss:$8 sps:$4 sm:$0xff]   ;;  %v3490_v22 = vld [vmem:[#allocation5 + $0x20] ss:$8 sps:$4 sm:$0xff]  }
  0x2f   :  { %1389 = vmatprep.subr.bf16.mxu1 %v3470_v9  ;;  %v3491_v23 = vld [vmem:[#allocation5 + $0x120] ss:$8 sps:$4 sm:$0xff]   ;;  %v3492_v24 = vld [vmem:[#allocation5 + $0x14] ss:$8 sps:$4 sm:$0xff]   ;;  %v3496_v26 = vld [vmem:[#allocation5 + $0x10] ss:$8 sps:$4 sm:$0xff]  }
  0x30   :  { %v3494_v25 = vld [vmem:[#allocation5 + $0x114] ss:$8 sps:$4 sm:$0xff]   ;;  %v3497_v27 = vld [vmem:[#allocation5 + $0x110] ss:$8 sps:$4 sm:$0xff]   ;;  %v3498_v28 = vld [vmem:[#allocation5 + $0x4] ss:$8 sps:$4 sm:$0xff]  }
  0x31   :  { %1257 = vmatpush1.bf16.msra.mxu0 %v3472_v10  ;;  %v3500_v29 = vld [vmem:[#allocation5 + $0x104] ss:$8 sps:$4 sm:$0xff]   ;;  %v3502_v30 = vld [vmem:[#allocation5] ss:$8 sps:$4 sm:$0xff]   ;;  %v3504_v32 = vld [vmem:[#allocation5 + $0xf4] ss:$8 sps:$4 sm:$0xff]  }
  0x32   :  { %1390 = vmatpush1.bf16.msra.mxu1 %v3473_v11  ;;  %1258 = vmatprep.subr.bf16.mxu0 %v3474_v12  ;;  %v3503_v31 = vld [vmem:[#allocation5 + $0x100] ss:$8 sps:$4 sm:$0xff]   ;;  %v3506_v33 = vld [vmem:[#allocation5 + $0x1f4] ss:$8 sps:$4 sm:$0xff]   ;;  %v3508_v34 = vld [vmem:[#allocation5 + $0xf0] ss:$8 sps:$4 sm:$0xff]  }
  0x33   :  { %1391 = vmatprep.subr.bf16.mxu1 %v3476_v13  ;;  %v3509_v35 = vld [vmem:[#allocation5 + $0x1f0] ss:$8 sps:$4 sm:$0xff]   ;;  %v3510_v36 = vld [vmem:[#allocation5 + $0xe4] ss:$8 sps:$4 sm:$0xff]   ;;  %v3514_v38 = vld [vmem:[#allocation5 + $0xe0] ss:$8 sps:$4 sm:$0xff]  }
  0x34   :  { %v3512_v37 = vld [vmem:[#allocation5 + $0x1e4] ss:$8 sps:$4 sm:$0xff]   ;;  %v3515_v39 = vld [vmem:[#allocation5 + $0x1e0] ss:$8 sps:$4 sm:$0xff]   ;;  %v3516_v40 = vld [vmem:[#allocation5 + $0xd4] ss:$8 sps:$4 sm:$0xff]  }
  0x35   :  { %1259 = vmatpush1.bf16.msra.mxu0 %v3478_v14  ;;  %v3518_v41 = vld [vmem:[#allocation5 + $0x1d4] ss:$8 sps:$4 sm:$0xff]   ;;  %v3520_v42 = vld [vmem:[#allocation5 + $0xd0] ss:$8 sps:$4 sm:$0xff]   ;;  %v3522_v44 = vld [vmem:[#allocation5 + $0xc4] ss:$8 sps:$4 sm:$0xff]  }
  0x36   :  { %1392 = vmatpush1.bf16.msra.mxu1 %v3479_v15  ;;  %1260 = vmatprep.subr.bf16.mxu0 %v3480_v16  ;;  %v3521_v43 = vld [vmem:[#allocation5 + $0x1d0] ss:$8 sps:$4 sm:$0xff]   ;;  %v3524_v45 = vld [vmem:[#allocation5 + $0x1c4] ss:$8 sps:$4 sm:$0xff]   ;;  %v3526_v47 = vld [vmem:[#allocation5 + $0xc0] ss:$8 sps:$4 sm:$0xff]  }
  0x37   :  { %1393 = vmatprep.subr.bf16.mxu1 %v3482_v17  ;;  %v65_v46 = vld [vmem:[#allocation2 + $0x8] sm:$0xff]  ;;  %v3527_v48 = vld [vmem:[#allocation5 + $0x1c0] ss:$8 sps:$4 sm:$0xff]   ;;  %v5011_v57 = vmov 1.0|1.0   ;;  %v66_v2 = vld [vmem:[#allocation2 + $0x10] sm:$0xff] }
  0x38   :  { %v3802_v49 = vunpack.c.0.s8 %v65_v46  ;;  %v3804_v50 = vunpack.c.1.s8 %v65_v46  ;;  %v67_v51 = vld [vmem:[#allocation2 + $0x18] sm:$0xff]  ;;  %v3528_v52 = vld [vmem:[#allocation5 + $0xb4] ss:$8 sps:$4 sm:$0xff]   ;;  %v3532_v56 = vld [vmem:[#allocation5 + $0xb0] ss:$8 sps:$4 sm:$0xff]   ;;  %v3820_v9 = vunpack.c.0.s8 %v66_v2  ;;  %v3822_v10 = vunpack.c.1.s8 %v66_v2  ;;  %s3751_s17 = smov [#allocation8]  }
  0x39   :  { %1261 = vmatpush1.bf16.msra.mxu0 %v3484_v18  ;;  %v3806_v53 = vunpack.c.0.s8 %v67_v51  ;;  %v3808_v54 = vunpack.c.1.s8 %v67_v51  ;;  %v3530_v55 = vld [vmem:[#allocation5 + $0x1b4] ss:$8 sps:$4 sm:$0xff]   ;;  %v3533_v58 = vld [vmem:[#allocation5 + $0x1b0] ss:$8 sps:$4 sm:$0xff]   ;;  %v3534_v59 = vld [vmem:[#allocation5 + $0xa4] ss:$8 sps:$4 sm:$0xff]   ;;  %v3824_v11 = vunpack.c.2.s8 %v65_v46  ;;  %v3826_v12 = vunpack.c.3.s8 %v65_v46 }
  0x3a   :  { %1394 = vmatpush1.bf16.msra.mxu1 %v3485_v19  ;;  %1262 = vmatprep.subr.bf16.mxu0 %v3486_v20  ;;  %vm100_vm0 = vcmp.eq.s32.totalorder %v3802_v49, 0  ;;  %vm107_vm1 = vcmp.eq.s32.totalorder %v3804_v50, 0  ;;  %v3536_v60 = vld [vmem:[#allocation5 + $0x1a4] ss:$8 sps:$4 sm:$0xff]   ;;  %v3538_v61 = vld [vmem:[#allocation5 + $0xa0] ss:$8 sps:$4 sm:$0xff]   ;;  %v3828_v13 = vunpack.c.2.s8 %v67_v51  ;;  %v3830_v14 = vunpack.c.3.s8 %v67_v51 }
  0x3b   :  { %1395 = vmatprep.subr.bf16.mxu1 %v3488_v21  ;;  %vm2950_vm2 = vmpackc.low %vm107_vm1, %vm100_vm0  ;;  %vm102_vm3 = vcmp.eq.s32.totalorder %v3806_v53, 0  ;;  %vm109_vm4 = vcmp.eq.s32.totalorder %v3808_v54, 0  ;;  %v3539_v62 = vld [vmem:[#allocation5 + $0x1a0] ss:$8 sps:$4 sm:$0xff]   ;;  %v3540_v63 = vld [vmem:[#allocation5 + $0x94] ss:$8 sps:$4 sm:$0xff]  }
  0x3c   :  { %2951 = vmatprep.mubr.msk.bf16.mxu0 %vm2950_vm2, %v5011_v57  ;;  %vm2990_vm5 = vmpackc.low %vm109_vm4, %vm102_vm3  ;;  %v3542_v0 = vld [vmem:[#allocation5 + $0x194] ss:$8 sps:$4 sm:$0xff]   ;;  %v64_v1 = vld [vmem:[#allocation2] sm:$0xff]  ;;  %vm101_vm8 = vcmp.eq.s32.totalorder %v3820_v9, 0  ;;  %vm108_vm9 = vcmp.eq.s32.totalorder %v3822_v10, 0  ;;  %vm114_vm10 = vcmp.eq.s32.totalorder %v3824_v11, 0 }
  0x3d   :  { %1263 = vmatpush1.bf16.msra.mxu0 %v3490_v22  ;;  %2991 = vmatprep.mubr.msk.bf16.mxu1 %vm2990_vm5, %v5011_v57  ;;  %v3544_v3 = vld [vmem:[#allocation5 + $0x90] ss:$8 sps:$4 sm:$0xff]   ;;  %v3546_v5 = vld [vmem:[#allocation5 + $0x84] ss:$8 sps:$4 sm:$0xff]   ;;  %v3816_v6 = vunpack.c.0.s8 %v64_v1  ;;  %v3818_v7 = vunpack.c.1.s8 %v64_v1  ;;  %v3550_v15 = vld [vmem:[#allocation5 + $0x80] ss:$8 sps:$4 sm:$0xff]   ;;  %v3844_v19 = vunpack.c.2.s8 %v64_v1  ;;  %v3846_v20 = vunpack.c.3.s8 %v64_v1 }
  0x3e   :  { %1396 = vmatpush1.bf16.msra.mxu1 %v3491_v23  ;;  %1264 = vmatprep.subr.bf16.mxu0 %v3492_v24  ;;  %v3545_v4 = vld [vmem:[#allocation5 + $0x190] ss:$8 sps:$4 sm:$0xff]   ;;  %v3548_v8 = vld [vmem:[#allocation5 + $0x184] ss:$8 sps:$4 sm:$0xff]   ;;  %v3551_v16 = vld [vmem:[#allocation5 + $0x180] ss:$8 sps:$4 sm:$0xff]   ;;  %v3848_v23 = vunpack.c.2.s8 %v66_v2  ;;  %v3850_v24 = vunpack.c.3.s8 %v66_v2 }
  0x3f   :  { %1397 = vmatprep.subr.bf16.mxu1 %v3494_v25  ;;  %vm99_vm6 = vcmp.eq.s32.totalorder %v3816_v6, 0  ;;  %vm106_vm7 = vcmp.eq.s32.totalorder %v3818_v7, 0  ;;  %v3554_v17 = vld [vmem:[#allocation5 + $0x274] ss:$8 sps:$4 sm:$0xff]   ;;  %vm121_vm11 = vcmp.eq.s32.totalorder %v3826_v12, 0  ;;  %vm116_vm13 = vcmp.eq.s32.totalorder %v3828_v13, 0  ;;  %vm2992_vm15 = vmpackc.low %vm108_vm9, %vm101_vm8 }
  0x40   :  { %vm3838_vm12 = vmpackc.low %vm106_vm7, %vm99_vm6  ;;  %vm123_vm14 = vcmp.eq.s32.totalorder %v3830_v14, 0  ;;  %v3552_v21 = vld [vmem:[#allocation5 + $0x270] ss:$8 sps:$4 sm:$0xff]   ;;  %v3557_v22 = vld [vmem:[#allocation5 + $0x264] ss:$8 sps:$4 sm:$0xff]   ;;  %vm113_vm2 = vcmp.eq.s32.totalorder %v3844_v19, 0 }
  0x41   :  { %1265 = vmatpush1.bf16.msra.mxu0 %v3496_v26  ;;  %vm2954_vm0 = vmpackc.low %vm121_vm11, %vm114_vm10  ;;  %vm120_vm3 = vcmp.eq.s32.totalorder %v3846_v20, 0  ;;  %v3555_v25 = vld [vmem:[#allocation5 + $0x260] ss:$8 sps:$4 sm:$0xff]   ;;  %vm115_vm4 = vcmp.eq.s32.totalorder %v3848_v23, 0  ;;  %vm122_vm5 = vcmp.eq.s32.totalorder %v3850_v24, 0  ;;  %vm128_vm6 = vcmp.eq.s32.totalorder %v3802_v49, 1 }
  0x42   :  { %1398 = vmatpush1.bf16.msra.mxu1 %v3497_v27  ;;  %1266 = vmatprep.subr.bf16.mxu0 %v3498_v28  ;;  %vm2994_vm1 = vmpackc.low %vm123_vm14, %vm116_vm13  ;;  %v3560_v26 = vld [vmem:[#allocation5 + $0x254] ss:$8 sps:$4 sm:$0xff]   ;;  %vm135_vm7 = vcmp.eq.s32.totalorder %v3804_v50, 1  ;;  %vm130_vm9 = vcmp.eq.s32.totalorder %v3806_v53, 1  ;;  %vm137_vm10 = vcmp.eq.s32.totalorder %v3808_v54, 1  ;;  %vm134_vm13 = vcmp.eq.s32.totalorder %v3818_v7, 1 }
  0x43   :  { %1399 = vmatprep.subr.bf16.mxu1 %v3500_v29  ;;  %vm3866_vm8 = vmpackc.low %vm120_vm3, %vm113_vm2  ;;  %v3558_v29 = vld [vmem:[#allocation5 + $0x250] ss:$8 sps:$4 sm:$0xff]   ;;  %vm142_vm2 = vcmp.eq.s32.totalorder %v3824_v11, 1  ;;  %vm149_vm3 = vcmp.eq.s32.totalorder %v3826_v12, 1  ;;  %v3567_v46 = vld [vmem:[#allocation5 + $0x220] ss:$8 sps:$4 sm:$0xff]  }
  0x44   :  { %vm3872_vm11 = vmpackc.low %vm122_vm5, %vm115_vm4  ;;  %vm144_vm5 = vcmp.eq.s32.totalorder %v3828_v13, 1  ;;  %v5046_v51 = vmov 0  ;;  %v3581_v1 = vld [vmem:[#allocation5 + $0x2e4] ss:$8 sps:$4 sm:$0xff]   ;;  %s2683_s18 = sshll.u32 %s3751_s17, 4  ;;  %s2684_s18 = int_to_ptr.vmem [resolvable:$true] %s2683_s18 }
  0x45   :  { %1267 = vmatpush1.bf16.msra.mxu0 %v3502_v30  ;;  %vm3878_vm14 = vmpackc.low %vm135_vm7, %vm128_vm6  ;;  %vm151_vm6 = vcmp.eq.s32.totalorder %v3830_v14, 1  ;;  %v3587_v28 = vld [vmem:[#allocation5 + $0x2c4] ss:$8 sps:$4 sm:$0xff]  }
  0x46   :  { %1400 = vmatpush1.bf16.msra.mxu1 %v3503_v31  ;;  %1268 = vmatprep.subr.bf16.mxu0 %v3504_v32  ;;  %v3563_v31 = vld [vmem:[#allocation5 + $0x244] ss:$8 sps:$4 sm:$0xff]   ;;  %v3600_v32 = vld [vmem:[#allocation5 + $0x300] ss:$8 sps:$4 sm:$0xff]  }
  0x47   :  { %1401 = vmatprep.subr.bf16.mxu1 %v3506_v33 }
  0x49   :  { %1269 = vmatpush2.bf16.msra.mxu0 %v3508_v34 }
  0x4a   :  { %1402 = vmatpush2.bf16.msra.mxu1 %v3509_v35  ;;  %1270 = vmatprep.subr.bf16.mxu0 %v3510_v36  ;;  %v3561_v35 = vld [vmem:[#allocation5 + $0x240] ss:$8 sps:$4 sm:$0xff]  }
  0x4b   :  { %1403 = vmatprep.subr.bf16.mxu1 %v3512_v37  ;;  %v3566_v37 = vld [vmem:[#allocation5 + $0x234] ss:$8 sps:$4 sm:$0xff]  }
  0x4d   :  { %1271 = vmatpush2.bf16.msra.mxu0 %v3514_v38  ;;  %v5032_v38 = vmov 0 }
  0x4e   :  { %1404 = vmatpush2.bf16.msra.mxu1 %v3515_v39  ;;  %1272 = vmatprep.subr.bf16.mxu0 %v3516_v40  ;;  %v5034_v39 = vmov 0  ;;  %v5036_v40 = vmov 0 }
  0x4f   :  { %1405 = vmatprep.subr.bf16.mxu1 %v3518_v41  ;;  %v3564_v41 = vld [vmem:[#allocation5 + $0x230] ss:$8 sps:$4 sm:$0xff]  }
  0x51   :  { %1273 = vmatpush2.bf16.msra.mxu0 %v3520_v42 }
  0x52   :  { %1406 = vmatpush2.bf16.msra.mxu1 %v3521_v43  ;;  %1274 = vmatprep.subr.bf16.mxu0 %v3522_v44  ;;  %v3569_v43 = vld [vmem:[#allocation5 + $0x224] ss:$8 sps:$4 sm:$0xff]   ;;  %v5040_v44 = vmov 0 }
  0x53   :  { %1407 = vmatprep.subr.bf16.mxu1 %v3524_v45  ;;  %v5042_v45 = vmov 0 }
  0x55   :  { %1275 = vmatpush2.bf16.msra.mxu0 %v3526_v47  ;;  %v5044_v47 = vmov 0 }
  0x56   :  { %1408 = vmatpush2.bf16.msra.mxu1 %v3527_v48  ;;  %1276 = vmatprep.subr.bf16.mxu0 %v3528_v52  ;;  %v3572_v48 = vld [vmem:[#allocation5 + $0x214] ss:$8 sps:$4 sm:$0xff]  }
  0x57   :  { %1409 = vmatprep.subr.bf16.mxu1 %v3530_v55  ;;  %v3570_v55 = vld [vmem:[#allocation5 + $0x210] ss:$8 sps:$4 sm:$0xff]  }
  0x59   :  { %1277 = vmatpush2.bf16.msra.mxu0 %v3532_v56  ;;  %v3575_v56 = vld [vmem:[#allocation5 + $0x204] ss:$8 sps:$4 sm:$0xff]  }
  0x5a   :  { %1410 = vmatpush2.bf16.msra.mxu1 %v3533_v58  ;;  %1278 = vmatprep.subr.bf16.mxu0 %v3534_v59  ;;  %v3573_v58 = vld [vmem:[#allocation5 + $0x200] ss:$8 sps:$4 sm:$0xff]  }
  0x5b   :  { %1411 = vmatprep.subr.bf16.mxu1 %v3536_v60  ;;  %v3578_v60 = vld [vmem:[#allocation5 + $0x2f4] ss:$8 sps:$4 sm:$0xff]   ;;  %v4253_v59 = vld [vmem:[#allocation7 + $0x30] sm:$0xff]  }
  0x5d   :  { %1279 = vmatpush2.bf16.msra.mxu0 %v3538_v61  ;;  %v70_v61 = vld [vmem:[#allocation2 + $0x30] sm:$0xff] }
  0x5e   :  { %1412 = vmatpush2.bf16.msra.mxu1 %v3539_v62  ;;  %1280 = vmatprep.subr.bf16.mxu0 %v3540_v63  ;;  %v4033_v2 = vunpack.c.0.s8 %v70_v61  ;;  %v4268_v62 = vld [vmem:[#allocation7 + $0x68] sm:$0xff]  }
  0x5f   :  { %1413 = vmatprep.subr.bf16.mxu1 %v3542_v0  ;;  %v3576_v0 = vld [vmem:[#allocation5 + $0x2f0] ss:$8 sps:$4 sm:$0xff]  }
  0x61   :  { %1281 = vmatpush2.bf16.msra.mxu0 %v3544_v3  ;;  %v3579_v3 = vld [vmem:[#allocation5 + $0x2e0] ss:$8 sps:$4 sm:$0xff]  }
  0x62   :  { %1414 = vmatpush2.bf16.msra.mxu1 %v3545_v4  ;;  %1282 = vmatprep.subr.bf16.mxu0 %v3546_v5  ;;  %v4041_v4 = vunpack.c.1.s8 %v70_v61  ;;  %v4043_v5 = vunpack.c.2.s8 %v70_v61 }
  0x63   :  { %1415 = vmatprep.subr.bf16.mxu1 %v3548_v8  ;;  %v3584_v8 = vld [vmem:[#allocation5 + $0x2d4] ss:$8 sps:$4 sm:$0xff]  }
  0x65   :  { %1283 = vmatpush2.bf16.msra.mxu0 %v3550_v15  ;;  %v4052_v15 = vunpack.c.3.s8 %v70_v61 }
  0x66   :  { %1416 = vmatpush2.bf16.msra.mxu1 %v3551_v16  ;;  %1518 = vmatprep.subr.bf16.mxu0 %v3554_v17  ;;  %v5009_v16 = vmov 0.0  }
  0x67   :  { %3412 = vmatprep.subr.bf16.mxu1 %v3554_v17 }
  0x68   :  { %2953 = vmatmul.mubr.msk.bf16.vlgmr.msra.gmra.mxu0 %vm3838_vm12, %v5011_v57  ;;  %vm127_vm12 = vcmp.eq.s32.totalorder %v3816_v6, 1 }
  0x69   :  { %2993 = vmatmul.mubr.msk.bf16.vlgmr.msra.gmra.mxu1 %vm2992_vm15, %v5011_v57  ;;  %2955 = vmatprep.mubr.msk.bf16.mxu0 %vm2954_vm0, %v5011_v57  ;;  %vm129_vm15 = vcmp.eq.s32.totalorder %v3820_v9, 1  ;;  %vm136_vm0 = vcmp.eq.s32.totalorder %v3822_v10, 1  ;;  %vm3890_vm4 = vmpackc.low %vm134_vm13, %vm127_vm12 }
  0x6a   :  { %3428 = vmatpush1.bf16.msra.mxu1 %v3552_v21  ;;  %2995 = vmatprep.mubr.msk.bf16.mxu1 %vm2994_vm1, %v5011_v57  ;;  %vm3884_vm1 = vmpackc.low %vm137_vm10, %vm130_vm9  ;;  %vm212_vm9 = vcmp.eq.s32.totalorder %v3802_v49, 4  ;;  %vm219_vm10 = vcmp.eq.s32.totalorder %v3804_v50, 4 }
  0x6b   :  { %3413 = vmatprep.subr.bf16.mxu1 %v3557_v22  ;;  %1519 = vmatpush1.bf16.msra.mxu0 %v3552_v21  ;;  %vm3902_vm7 = vmpackc.low %vm136_vm0, %vm129_vm15  ;;  %vm218_vm15 = vcmp.eq.s32.totalorder %v3818_v7, 4 }
  0x6c   :  { %1520 = vmatprep.subr.bf16.mxu0 %v3557_v22  ;;  %vm3911_vm12 = vmpackc.low %vm149_vm3, %vm142_vm2  ;;  %vm220_vm2 = vcmp.eq.s32.totalorder %v3822_v10, 4 }
  0x6d   :  { %vm3924_vm13 = vmpackc.low %vm151_vm6, %vm144_vm5  ;;  %vm226_vm5 = vcmp.eq.s32.totalorder %v3824_v11, 4  ;;  %vm233_vm6 = vcmp.eq.s32.totalorder %v3826_v12, 4 }
  0x6e   :  { %3429 = vmatpush1.bf16.msra.mxu1 %v3555_v25  ;;  %v5033_v38 = vsel %vm3924_vm13, 4294967295, %v5032_v38  ;;  %vm3932_vm0 = vmpackc.low %vm219_vm10, %vm212_vm9  ;;  %vm228_vm10 = vcmp.eq.s32.totalorder %v3828_v13, 4 }
  0x6f   :  { %3414 = vmatprep.subr.bf16.mxu1 %v3560_v26  ;;  %1521 = vmatpush1.bf16.msra.mxu0 %v3555_v25  ;;  %v5035_v39 = vsel %vm3932_vm0, 4294967295, %v5034_v39  ;;  %vm235_vm0 = vcmp.eq.s32.totalorder %v3830_v14, 4  ;;  %vm3956_vm13 = vmpackc.low %vm233_vm6, %vm226_vm5  ;;  %v3582_v25 = vld [vmem:[#allocation5 + $0x2d0] ss:$8 sps:$4 sm:$0xff]  }
  0x70   :  { %2957 = vmatmul.mubr.msk.bf16.gmra.mxu0 %vm3866_vm8, %v5011_v57  ;;  %vm214_vm8 = vcmp.eq.s32.totalorder %v3806_v53, 4  ;;  %1522 = vmatprep.subr.bf16.mxu0 %v3560_v26  ;;  %v5043_v45 = vsel %vm3956_vm13, 4294967295, %v5042_v45  ;;  %vm3972_vm5 = vmpackc.low %vm235_vm0, %vm228_vm10  ;;  %vm5048_vm0 = vnez %v5033_v38  ;;  %vm163_vm10 = vcmp.eq.s32.totalorder %v3804_v50, 2 }
  0x71   :  { %2997 = vmatmul.mubr.msk.bf16.gmra.mxu1 %vm3872_vm11, %v5011_v57  ;;  %2959 = vmatprep.mubr.msk.bf16.mxu0 %vm3878_vm14, %v5011_v57  ;;  %vm221_vm11 = vcmp.eq.s32.totalorder %v3808_v54, 4  ;;  %vm211_vm14 = vcmp.eq.s32.totalorder %v3816_v6, 4  ;;  %v5045_v47 = vsel %vm3972_vm5, 4294967295, %v5044_v47 }
  0x72   :  { %3430 = vmatpush1.bf16.msra.mxu1 %v3558_v29  ;;  %2999 = vmatprep.mubr.msk.bf16.mxu1 %vm3884_vm1, %v5011_v57  ;;  %vm213_vm1 = vcmp.eq.s32.totalorder %v3820_v9, 4  ;;  %vm3938_vm3 = vmpackc.low %vm221_vm11, %vm214_vm8  ;;  %vm225_vm11 = vcmp.eq.s32.totalorder %v3844_v19, 4 }
  0x73   :  { %3415 = vmatprep.subr.bf16.mxu1 %v3563_v31  ;;  %1523 = vmatpush1.bf16.msra.mxu0 %v3558_v29  ;;  %v5037_v40 = vsel %vm3938_vm3, 4294967295, %v5036_v40  ;;  %vm3944_vm9 = vmpackc.low %vm218_vm15, %vm211_vm14  ;;  %vm232_vm3 = vcmp.eq.s32.totalorder %v3846_v20, 4  ;;  %vm227_vm14 = vcmp.eq.s32.totalorder %v3848_v23, 4  ;;  %vm234_vm15 = vcmp.eq.s32.totalorder %v3850_v24, 4 }
  0x74   :  { %1524 = vmatprep.subr.bf16.mxu0 %v3563_v31  ;;  %vm3950_vm8 = vmpackc.low %vm220_vm2, %vm213_vm1  ;;  %vm148_vm2 = vcmp.eq.s32.totalorder %v3846_v20, 1 }
  0x75   :  { %v5041_v44 = vsel %vm3950_vm8, 4294967295, %v5040_v44  ;;  %vm3985_vm6 = vmpackc.low %vm232_vm3, %vm225_vm11  ;;  %vm5051_vm3 = vcmp.eq.s32.totalorder %v3844_v19, 1 }
  0x76   :  { %3431 = vmatpush1.bf16.msra.mxu1 %v3561_v35  ;;  %v5047_v51 = vsel %vm3985_vm6, 4294967295, %v5046_v51  ;;  %vm3998_vm1 = vmpackc.low %vm234_vm15, %vm227_vm14  ;;  %vm158_vm6 = vcmp.eq.s32.totalorder %v3806_v53, 2  ;;  %vm155_vm14 = vcmp.eq.s32.totalorder %v3816_v6, 2  ;;  %vm162_vm15 = vcmp.eq.s32.totalorder %v3818_v7, 2 }
  0x77   :  { %3416 = vmatprep.subr.bf16.mxu1 %v3566_v37  ;;  %vm2964_vm11 = vmpackc.low %vm148_vm2, %vm5051_vm3  ;;  %1525 = vmatpush1.bf16.msra.mxu0 %v3561_v35  ;;  %vm157_vm2 = vcmp.eq.s32.totalorder %v3820_v9, 2  ;;  %v3749_v35 = vmov 0  }
  0x78   :  { %2961 = vmatmul.mubr.msk.bf16.gmra.mxu0 %vm3890_vm4, %v5011_v57  ;;  %vm143_vm4 = vcmp.eq.s32.totalorder %v3848_v23, 1  ;;  %1526 = vmatprep.subr.bf16.mxu0 %v3566_v37 }
  0x79   :  { %3001 = vmatmul.mubr.msk.bf16.gmra.mxu1 %vm3902_vm7, %v5011_v57  ;;  %2963 = vmatprep.mubr.msk.bf16.mxu0 %vm3911_vm12, %v5011_v57  ;;  %vm150_vm7 = vcmp.eq.s32.totalorder %v3850_v24, 1  ;;  %vm156_vm12 = vcmp.eq.s32.totalorder %v3802_v49, 2 }
  0x7a   :  { %3432 = vmatpush1.bf16.msra.mxu1 %v3564_v41  ;;  %3003 = vmatprep.mubr.msk.bf16.mxu1 %vm5048_vm0, %v5011_v57  ;;  %vm165_vm0 = vcmp.eq.s32.totalorder %v3808_v54, 2  ;;  %vm3004_vm5 = vmpackc.low %vm150_vm7, %vm143_vm4  ;;  %vm164_vm4 = vcmp.eq.s32.totalorder %v3822_v10, 2  ;;  %vm170_vm7 = vcmp.eq.s32.totalorder %v3824_v11, 2 }
  0x7b   :  { %3417 = vmatprep.subr.bf16.mxu1 %v3569_v43  ;;  %vm2966_vm13 = vmpackc.low %vm163_vm10, %vm156_vm12  ;;  %1527 = vmatpush1.bf16.msra.mxu0 %v3564_v41 }
  0x7c   :  { %vm3006_vm8 = vmpackc.low %vm165_vm0, %vm158_vm6  ;;  %1528 = vmatprep.subr.bf16.mxu0 %v3569_v43  ;;  %vm177_vm6 = vcmp.eq.s32.totalorder %v3826_v12, 2  ;;  %vm176_vm0 = vcmp.eq.s32.totalorder %v3846_v20, 2 }
  0x7d   :  { %vm3008_vm12 = vmpackc.low %vm164_vm4, %vm157_vm2  ;;  %vm184_vm2 = vcmp.eq.s32.totalorder %v3802_v49, 3  ;;  %vm191_vm4 = vcmp.eq.s32.totalorder %v3804_v50, 3  ;;  %v3585_v49 = vld [vmem:[#allocation5 + $0x2c0] ss:$8 sps:$4 sm:$0xff]   ;;  %v3590_v50 = vld [vmem:[#allocation5 + $0x2b4] ss:$8 sps:$4 sm:$0xff]  }
  0x7e   :  { %3433 = vmatpush1.bf16.msra.mxu1 %v3567_v46  ;;  %vm4022_vm10 = vmpackc.low %vm177_vm6, %vm170_vm7  ;;  %vm217_vm7 = vcmp.eq.s32.totalorder %v4033_v2, 4  ;;  %vm186_vm6 = vcmp.eq.s32.totalorder %v3806_v53, 3  ;;  %v3588_v53 = vld [vmem:[#allocation5 + $0x2b0] ss:$8 sps:$4 sm:$0xff]  }
  0x7f   :  { %3418 = vmatprep.subr.bf16.mxu1 %v3572_v48  ;;  %1529 = vmatpush1.bf16.msra.mxu0 %v3567_v46  ;;  %v4058_v17 = vsel %vm217_vm7, 1.0, %v5009_v16  ;;  %vm198_vm7 = vcmp.eq.s32.totalorder %v3824_v11, 3  ;;  %v3599_v11 = vld [vmem:[#allocation5 + $0x284] ss:$8 sps:$4 sm:$0xff]  }
  0x80   :  { %2965 = vmatmul.mubr.msk.bf16.gmra.mxu0 %vm2964_vm11, %v5011_v57  ;;  %1530 = vmatprep.subr.bf16.mxu0 %v3572_v48  ;;  %vm169_vm11 = vcmp.eq.s32.totalorder %v3844_v19, 2 }
  0x81   :  { %3005 = vmatmul.mubr.msk.bf16.gmra.mxu1 %vm3004_vm5, %v5011_v57  ;;  %2967 = vmatprep.mubr.msk.bf16.mxu0 %vm2966_vm13, %v5011_v57  ;;  %vm4016_vm5 = vmpackc.low %vm162_vm15, %vm155_vm14  ;;  %vm172_vm13 = vcmp.eq.s32.totalorder %v3828_v13, 2  ;;  %vm171_vm14 = vcmp.eq.s32.totalorder %v3848_v23, 2  ;;  %vm178_vm15 = vcmp.eq.s32.totalorder %v3850_v24, 2 }
  0x82   :  { %3007 = vmatprep.mubr.msk.bf16.mxu1 %vm3006_vm8, %v5011_v57  ;;  %3434 = vmatpush1.bf16.msra.mxu1 %v3570_v55  ;;  %vm179_vm8 = vcmp.eq.s32.totalorder %v3830_v14, 2 }
  0x83   :  { %3419 = vmatprep.subr.bf16.mxu1 %v3575_v56  ;;  %vm4026_vm3 = vmpackc.low %vm179_vm8, %vm172_vm13  ;;  %1531 = vmatpush1.bf16.msra.mxu0 %v3570_v55  ;;  %vm231_vm13 = vcmp.eq.s32.totalorder %v4043_v5, 4 }
  0x84   :  { %1532 = vmatprep.subr.bf16.mxu0 %v3575_v56  ;;  %vm4065_vm8 = vmpackc.low %vm176_vm0, %vm169_vm11  ;;  %v4075_v22 = vsel %vm231_vm13, 1.0, %v5009_v16  ;;  %vm200_vm13 = vcmp.eq.s32.totalorder %v3828_v13, 3  ;;  %v69_v13 = vld [vmem:[#allocation2 + $0x28] sm:$0xff]  ;;  %v4250_v56 = vld [vmem:[#allocation7 + $0x70] sm:$0xff]  }
  0x85   :  { %vm2974_vm11 = vmpackc.low %vm191_vm4, %vm184_vm2  ;;  %vm185_vm2 = vcmp.eq.s32.totalorder %v3820_v9, 3  ;;  %vm192_vm4 = vcmp.eq.s32.totalorder %v3822_v10, 3  ;;  %v3596_v9 = vld [vmem:[#allocation5 + $0x294] ss:$8 sps:$4 sm:$0xff]   ;;  %v3594_v10 = vld [vmem:[#allocation5 + $0x290] ss:$8 sps:$4 sm:$0xff]   ;;  %v4148_v30 = vunpack.c.2.s8 %v69_v13  ;;  %v4150_v31 = vunpack.c.3.s8 %v69_v13 }
  0x86   :  { %3435 = vmatpush1.bf16.msra.mxu1 %v3573_v58 }
  0x87   :  { %3420 = vmatprep.subr.bf16.mxu1 %v3578_v60  ;;  %1533 = vmatpush1.bf16.msra.mxu0 %v3573_v58 }
  0x88   :  { %2969 = vmatmul.mubr.msk.bf16.gmra.mxu0 %vm4016_vm5, %v5011_v57  ;;  %vm224_vm5 = vcmp.eq.s32.totalorder %v4041_v4, 4  ;;  %1534 = vmatprep.subr.bf16.mxu0 %v3578_v60 }
  0x89   :  { %3009 = vmatmul.mubr.msk.bf16.gmra.mxu1 %vm3008_vm12, %v5011_v57  ;;  %2971 = vmatprep.mubr.msk.bf16.mxu0 %vm4022_vm10, %v5011_v57  ;;  %vm193_vm12 = vcmp.eq.s32.totalorder %v3808_v54, 3  ;;  %v4071_v21 = vsel %vm224_vm5, 1.0, %v5009_v16  ;;  %vm238_vm10 = vcmp.eq.s32.totalorder %v4052_v15, 4 }
  0x8a   :  { %3011 = vmatprep.mubr.msk.bf16.mxu1 %vm4026_vm3, %v5011_v57  ;;  %3436 = vmatpush2.bf16.msra.mxu1 %v3576_v0  ;;  %vm3012_vm3 = vmpackc.low %vm178_vm15, %vm171_vm14  ;;  %v581_v26 = vpack.c.bf16 %v4071_v21, %v4058_v17  ;;  %v4084_v54 = vsel %vm238_vm10, 1.0, %v5009_v16  ;;  %vm183_vm14 = vcmp.eq.s32.totalorder %v3816_v6, 3  ;;  %vm190_vm15 = vcmp.eq.s32.totalorder %v3818_v7, 3  ;;  %v3593_v6 = vld [vmem:[#allocation5 + $0x2a4] ss:$8 sps:$4 sm:$0xff]  }
  0x8b   :  { %3421 = vmatprep.subr.bf16.mxu1 %v3581_v1  ;;  %v588_v27 = vpack.c.bf16 %v4084_v54, %v4075_v22  ;;  %vm3014_vm0 = vmpackc.low %vm193_vm12, %vm186_vm6  ;;  %1535 = vmatpush2.bf16.msra.mxu0 %v3576_v0  ;;  %vm205_vm6 = vcmp.eq.s32.totalorder %v3826_v12, 3  ;;  %v3591_v7 = vld [vmem:[#allocation5 + $0x2a0] ss:$8 sps:$4 sm:$0xff]   ;;  %v4271_v0 = vld [vmem:[#allocation7 + $0x28] sm:$0xff]   ;;  %v721_v17 = vlaneseq }
  0x8c   :  { %1536 = vmatprep.subr.bf16.mxu0 %v3581_v1  ;;  %vm2976_vm5 = vmpackc.low %vm190_vm15, %vm183_vm14  ;;  %vm199_vm14 = vcmp.eq.s32.totalorder %v3848_v23, 3  ;;  %vm206_vm15 = vcmp.eq.s32.totalorder %v3850_v24, 3  ;;  %v3597_v12 = vld [vmem:[#allocation5 + $0x280] ss:$8 sps:$4 sm:$0xff]  }
  0x8d   :  { %vm3016_vm12 = vmpackc.low %vm192_vm4, %vm185_vm2  ;;  %v68_v23 = vld [vmem:[#allocation2 + $0x20] sm:$0xff]  ;;  %v722_v21 = vshrl.u32 %v721_v17, 7 }
  0x8e   :  { %3437 = vmatpush2.bf16.msra.mxu1 %v3579_v3  ;;  %vm2978_vm10 = vmpackc.low %vm205_vm6, %vm198_vm7  ;;  %vm5060_vm7 = vnez %v5035_v39  ;;  %vm5061_vm6 = vnez %v5037_v40  ;;  %v4144_v24 = vunpack.c.0.s8 %v68_v23  ;;  %v4146_v29 = vunpack.c.1.s8 %v68_v23  ;;  %v719_v22 = vld [vmem:[%s5004_s2] sm:$0x3] }
  0x8f   :  { %3422 = vmatprep.subr.bf16.mxu1 %v3584_v8  ;;  %1537 = vmatpush2.bf16.msra.mxu0 %v3579_v3  ;;  %vm3020_vm4 = vmpackc.low %vm206_vm15, %vm199_vm14  ;;  %vm5065_vm14 = vnez %v5047_v51  ;;  %v4168_v33 = vunpack.c.2.s8 %v68_v23  ;;  %v4170_v34 = vunpack.c.3.s8 %v68_v23  ;;  %v4233_v51 = vld [vmem:[#allocation7 + $0x38] sm:$0xff]   ;;  %v727_v54 = vsub.s32 1, %v722_v21 }
  0x90   :  { %2973 = vmatmul.mubr.msk.bf16.gmra.mxu0 %vm4065_vm8, %v5011_v57  ;;  %vm207_vm8 = vcmp.eq.s32.totalorder %v3830_v14, 3  ;;  %1538 = vmatprep.subr.bf16.mxu0 %v3584_v8  ;;  %v3602_v14 = vld [vmem:[#allocation5 + $0x304] ss:$8 sps:$4 sm:$0xff]   ;;  %vm103_vm15 = vcmp.eq.s32.totalorder %v4144_v24, 0  ;;  %v4283_v8 = vld [vmem:[#allocation7 + $0x60] sm:$0xff]  }
  0x91   :  { %3013 = vmatmul.mubr.msk.bf16.gmra.mxu1 %vm3012_vm3, %v5011_v57  ;;  %2975 = vmatprep.mubr.msk.bf16.mxu0 %vm2974_vm11, %v5011_v57  ;;  %vm3018_vm3 = vmpackc.low %vm207_vm8, %vm200_vm13  ;;  %vm197_vm11 = vcmp.eq.s32.totalorder %v3844_v19, 3  ;;  %v4124_v19 = vunpack.c.0.s8 %v69_v13  ;;  %vm5063_vm13 = vnez %v5043_v45  ;;  %vm5064_vm8 = vnez %v5045_v47  ;;  %v4230_v47 = vld [vmem:[#allocation7 + $0x78] sm:$0xff]  }
  0x92   :  { %3015 = vmatprep.mubr.msk.bf16.mxu1 %vm3014_vm0, %v5011_v57  ;;  %3438 = vmatpush2.bf16.msra.mxu1 %v3582_v25  ;;  %vm204_vm0 = vcmp.eq.s32.totalorder %v3846_v20, 3  ;;  %v4126_v20 = vunpack.c.1.s8 %v69_v13  ;;  %5066 = vst [vmem:[#allocation15_spill] sm:$0xff] %v4230_v47 }
  0x93   :  { %3423 = vmatprep.subr.bf16.mxu1 %v3587_v28  ;;  %1539 = vmatpush2.bf16.msra.mxu0 %v3582_v25  ;;  %vm2980_vm2 = vmpackc.low %vm204_vm0, %vm197_vm11 }
  0x94   :  { %1540 = vmatprep.subr.bf16.mxu0 %v3587_v28  ;;  %v4297_v28 = vld [vmem:[#allocation7 + $0x58] sm:$0xff]  }
  0x96   :  { %3439 = vmatpush2.bf16.msra.mxu1 %v3585_v49 }
  0x97   :  { %3424 = vmatprep.subr.bf16.mxu1 %v3590_v50  ;;  %1541 = vmatpush2.bf16.msra.mxu0 %v3585_v49  ;;  %v4300_v49 = vld [vmem:[#allocation7 + $0x18] sm:$0xff]  }
  0x98   :  { %2977 = vmatmul.mubr.msk.bf16.gmra.mxu0 %vm2976_vm5, %v5011_v57  ;;  %1542 = vmatprep.subr.bf16.mxu0 %v3590_v50  ;;  %vm5062_vm5 = vnez %v5041_v44  ;;  %v4310_v50 = vld [vmem:[#allocation7 + $0x10] sm:$0xff]  }
  0x99   :  { %3017 = vmatmul.mubr.msk.bf16.gmra.mxu1 %vm3016_vm12, %v5011_v57  ;;  %2979 = vmatprep.mubr.msk.bf16.mxu0 %vm2978_vm10, %v5011_v57  ;;  %vm104_vm12 = vcmp.eq.s32.totalorder %v4124_v19, 0  ;;  %vm111_vm10 = vcmp.eq.s32.totalorder %v4126_v20, 0 }
  0x9a   :  { %3019 = vmatprep.mubr.msk.bf16.mxu1 %vm3018_vm3, %v5011_v57  ;;  %3440 = vmatpush2.bf16.msra.mxu1 %v3588_v53  ;;  %vm223_vm3 = vcmp.eq.s32.totalorder %v4126_v20, 4  ;;  %vm3030_vm11 = vmpackc.low %vm111_vm10, %vm104_vm12 }
  0x9b   :  { %3425 = vmatprep.subr.bf16.mxu1 %v3593_v6  ;;  %1543 = vmatpush2.bf16.msra.mxu0 %v3588_v53  ;;  %v4320_v53 = vld [vmem:[#allocation7 + $0x48] sm:$0xff]  }
  0x9c   :  { %1544 = vmatprep.subr.bf16.mxu0 %v3593_v6  ;;  %v4322_v6 = vld [vmem:[#allocation7 + $0x8] sm:$0xff]  }
  0x9e   :  { %3441 = vmatpush2.bf16.msra.mxu1 %v3591_v7 }
  0x9f   :  { %3426 = vmatprep.subr.bf16.mxu1 %v3596_v9  ;;  %1545 = vmatpush2.bf16.msra.mxu0 %v3591_v7  ;;  %v4328_v7 = vld [vmem:[#allocation7 + $0x40] sm:$0xff]  }
  0xa0   :  { %2981 = vmatmul.mubr.msk.bf16.gmra.mxu0 %vm2980_vm2, %v5011_v57  ;;  %1546 = vmatprep.subr.bf16.mxu0 %v3596_v9  ;;  %vm110_vm2 = vcmp.eq.s32.totalorder %v4146_v29, 0  ;;  %v4330_v9 = vld [vmem:[#allocation7] sm:$0xff]  }
  0xa1   :  { %3021 = vmatmul.mubr.msk.bf16.gmra.mxu1 %vm3020_vm4, %v5011_v57  ;;  %2983 = vmatprep.mubr.msk.bf16.mxu0 %vm5060_vm7, %v5011_v57  ;;  %vm215_vm4 = vcmp.eq.s32.totalorder %v4144_v24, 4  ;;  %vm222_vm7 = vcmp.eq.s32.totalorder %v4146_v29, 4  ;;  %5067 = vst [vmem:[#allocation16_spill] sm:$0xff] %v4330_v9 }
  0xa2   :  { %3023 = vmatprep.mubr.msk.bf16.mxu1 %vm5061_vm6, %v5011_v57  ;;  %3442 = vmatpush2.bf16.msra.mxu1 %v3594_v10  ;;  %vm118_vm6 = vcmp.eq.s32.totalorder %v4148_v30, 0  ;;  %vm3064_vm12 = vmpackc.low %vm222_vm7, %vm215_vm4 }
  0xa3   :  { %3427 = vmatprep.subr.bf16.mxu1 %v3599_v11  ;;  %1547 = vmatpush2.bf16.msra.mxu0 %v3594_v10  ;;  %v4347_v10 = vrot.slane %v719_v22, %v727_v54 }
  0xa4   :  { %1548 = vmatprep.subr.bf16.mxu0 %v3599_v11 }
  0xa6   :  { %3443 = vmatpush2.bf16.msra.mxu1 %v3597_v12 }
  0xa7   :  { %1665 = vmatprep.subr.bf16.mxu1 %v3602_v14  ;;  %1549 = vmatpush2.bf16.msra.mxu0 %v3597_v12 }
  0xa8   :  { %2985 = vmatmul.mubr.msk.bf16.gmra.mxu0 %vm3944_vm9, %v5011_v57  ;;  %vm216_vm9 = vcmp.eq.s32.totalorder %v4124_v19, 4  ;;  %3272 = vmatprep.subr.bf16.mxu0 %v4230_v47 }
  0xa9   :  { %3025 = vmatmul.mubr.msk.bf16.gmra.mxu1 %vm5062_vm5, %v5011_v57  ;;  %2987 = vmatprep.mubr.msk.bf16.mxu0 %vm5063_vm13, %v5011_v57  ;;  %vm3062_vm0 = vmpackc.low %vm223_vm3, %vm216_vm9  ;;  %vm125_vm5 = vcmp.eq.s32.totalorder %v4150_v31, 0  ;;  %vm117_vm3 = vcmp.eq.s32.totalorder %v4168_v33, 0 }
  0xaa   :  { %3027 = vmatprep.mubr.msk.bf16.mxu1 %vm5064_vm8, %v5011_v57  ;;  %vm3032_vm13 = vmpackc.low %vm110_vm2, %vm103_vm15  ;;  %vm230_vm8 = vcmp.eq.s32.totalorder %v4148_v30, 4  ;;  %vm132_vm15 = vcmp.eq.s32.totalorder %v4124_v19, 1  ;;  %vm139_vm2 = vcmp.eq.s32.totalorder %v4126_v20, 1 }
  0xab   :  { %vm3034_vm10 = vmpackc.low %vm125_vm5, %vm118_vm6  ;;  %vm105_vm5 = vcmp.eq.s32.totalorder %v4033_v2, 0 }
  0xac   :  { %vm3038_vm6 = vmpackc.low %vm139_vm2, %vm132_vm15  ;;  %v2718_v36 = vsel %vm105_vm5, 1.0, %v5009_v16  ;;  %vm145_vm15 = vcmp.eq.s32.totalorder %v4168_v33, 1  ;;  %vm152_vm2 = vcmp.eq.s32.totalorder %v4170_v34, 1 }
  0xb0   :  { %2989 = vmatmul.mubr.msk.bf16.gmra.mxu0 %vm5065_vm14, %v5011_v57  ;;  %vm236_vm14 = vcmp.eq.s32.totalorder %v4170_v34, 4 }
  0xb1   :  { %3029 = vmatmul.mubr.msk.bf16.gmra.mxu1 %vm3998_vm1, %v5011_v57  ;;  %3031 = vmatprep.mubr.msk.bf16.mxu0 %vm3030_vm11, %v5011_v57  ;;  %vm237_vm1 = vcmp.eq.s32.totalorder %v4150_v31, 4  ;;  %vm124_vm11 = vcmp.eq.s32.totalorder %v4170_v34, 0 }
  0xb2   :  { %3063 = vmatprep.mubr.msk.bf16.mxu1 %vm3062_vm0, %v5011_v57  ;;  %vm3066_vm9 = vmpackc.low %vm237_vm1, %vm230_vm8  ;;  %vm229_vm0 = vcmp.eq.s32.totalorder %v4168_v33, 4  ;;  %vm131_vm8 = vcmp.eq.s32.totalorder %v4144_v24, 1  ;;  %vm138_vm1 = vcmp.eq.s32.totalorder %v4146_v29, 1 }
  0xb3   :  { %vm3036_vm4 = vmpackc.low %vm124_vm11, %vm117_vm3  ;;  %vm1221_vm3 = vcmask 130048  }
  0xb4   :  { %vm3068_vm7 = vmpackc.low %vm236_vm14, %vm229_vm0  ;;  %vm119_vm0 = vcmp.eq.s32.totalorder %v4043_v5, 0  ;;  %vm126_vm14 = vcmp.eq.s32.totalorder %v4052_v15, 0 }
  0xb5   :  { %v2732_v39 = vsel %vm119_vm0, 1.0, %v5009_v16  ;;  %v2739_v40 = vsel %vm126_vm14, 1.0, %v5009_v16  ;;  %vm147_vm14 = vcmp.eq.s32.totalorder %v4043_v5, 1 }
  0xb6   :  { %v532_v41 = vpack.c.bf16 %v2739_v40, %v2732_v39  ;;  %v2760_v45 = vsel %vm147_vm14, 1.0, %v5009_v16 }
  0xb8   :  { %3033 = vmatmul.mubr.msk.bf16.vlgmr.msra.gmra.mxu0 %vm3032_vm13, %v5011_v57  ;;  %vm112_vm13 = vcmp.eq.s32.totalorder %v4041_v4, 0 }
  0xb9   :  { %3065 = vmatmul.mubr.msk.bf16.vlgmr.msra.gmra.mxu1 %vm3064_vm12, %v5011_v57  ;;  %3035 = vmatprep.mubr.msk.bf16.mxu0 %vm3034_vm10, %v5011_v57  ;;  %v2725_v37 = vsel %vm112_vm13, 1.0, %v5009_v16  ;;  %vm146_vm12 = vcmp.eq.s32.totalorder %v4148_v30, 1  ;;  %vm153_vm10 = vcmp.eq.s32.totalorder %v4150_v31, 1  ;;  %vm133_vm13 = vcmp.eq.s32.totalorder %v4033_v2, 1 }
  0xba   :  { %1666 = vmatpush1.bf16.msra.mxu1 %v3600_v32  ;;  %3067 = vmatprep.mubr.msk.bf16.mxu1 %vm3066_vm9, %v5011_v57  ;;  %v525_v38 = vpack.c.bf16 %v2725_v37, %v2718_v36  ;;  %vm3040_vm9 = vmpackc.low %vm138_vm1, %vm131_vm8  ;;  %vm140_vm8 = vcmp.eq.s32.totalorder %v4041_v4, 1  ;;  %v2746_v42 = vsel %vm133_vm13, 1.0, %v5009_v16  ;;  %vm159_vm1 = vcmp.eq.s32.totalorder %v4144_v24, 2 }
  0xbb   :  { %vm3042_vm11 = vmpackc.low %vm153_vm10, %vm146_vm12  ;;  %v2753_v43 = vsel %vm140_vm8, 1.0, %v5009_v16  ;;  %vm166_vm12 = vcmp.eq.s32.totalorder %v4146_v29, 2  ;;  %vm174_vm10 = vcmp.eq.s32.totalorder %v4148_v30, 2  ;;  %3300 = vmatprep.subr.bf16.mxu1 %v4230_v47  ;;  %vm161_vm8 = vcmp.eq.s32.totalorder %v4033_v2, 2  ;;  %3273 = vmatpush3.bf16.msra.mxu0 %v4233_v51 }
  0xbc   :  { %v539_v44 = vpack.c.bf16 %v2753_v43, %v2746_v42  ;;  %v2774_v52 = vsel %vm161_vm8, 1.0, %v5009_v16  ;;  %3274 = vmatprep.subr.bf16.mxu0 %v4250_v56  ;;  %vm203_vm8 = vcmp.eq.s32.totalorder %v4043_v5, 3 }
  0xbf   :  { %3275 = vmatpush3.bf16.msra.mxu0 %v4253_v59 }
  0xc0   :  { %3037 = vmatmul.mubr.msk.bf16.gmra.mxu0 %vm3036_vm4, %v5011_v57  ;;  %vm160_vm4 = vcmp.eq.s32.totalorder %v4124_v19, 2  ;;  %3276 = vmatprep.subr.bf16.mxu0 %v4268_v62 }
  0xc1   :  { %3069 = vmatmul.mubr.msk.bf16.gmra.mxu1 %vm3068_vm7, %v5011_v57  ;;  %3039 = vmatprep.mubr.msk.bf16.mxu0 %vm3038_vm6, %v5011_v57  ;;  %vm167_vm7 = vcmp.eq.s32.totalorder %v4126_v20, 2  ;;  %vm3044_vm6 = vmpackc.low %vm152_vm2, %vm145_vm15  ;;  %vm154_vm15 = vcmp.eq.s32.totalorder %v4052_v15, 1  ;;  %vm173_vm2 = vcmp.eq.s32.totalorder %v4168_v33, 2 }
  0xc2   :  { %1683 = vmatprep.mubr.bf16.mxu1 %v3749_v35  ;;  %vm3046_vm5 = vmpackc.low %vm167_vm7, %vm160_vm4  ;;  %v2767_v46 = vsel %vm154_vm15, 1.0, %v5009_v16  ;;  %vm180_vm4 = vcmp.eq.s32.totalorder %v4170_v34, 2  ;;  %vm188_vm7 = vcmp.eq.s32.totalorder %v4124_v19, 3  ;;  %vm175_vm15 = vcmp.eq.s32.totalorder %v4043_v5, 2 }
  0xc3   :  { %v546_v48 = vpack.c.bf16 %v2767_v46, %v2760_v45  ;;  %v2788_v60 = vsel %vm175_vm15, 1.0, %v5009_v16  ;;  %3277 = vmatpush3.bf16.msra.mxu0 %v4271_v0 }
  0xc4   :  { %3278 = vmatprep.subr.bf16.mxu0 %v4283_v8 }
  0xc8   :  { %3041 = vmatmul.mubr.msk.bf16.gmra.mxu0 %vm3040_vm9, %v5011_v57  ;;  %vm181_vm9 = vcmp.eq.s32.totalorder %v4150_v31, 2 }
  0xc9   :  { %3070 = vmatmul.mubr.msk.bf16.vlgmr.msra.gmra.mxu1 %vm1221_vm3, %v525_v38  ;;  %3043 = vmatprep.mubr.msk.bf16.mxu0 %vm3042_vm11, %v5011_v57  ;;  %vm3048_vm11 = vmpackc.low %vm166_vm12, %vm159_vm1  ;;  %vm168_vm1 = vcmp.eq.s32.totalorder %v4041_v4, 2  ;;  %vm187_vm12 = vcmp.eq.s32.totalorder %v4144_v24, 3 }
  0xca   :  { %1693 = vmatprep.mubr.bf16.mxu1 %v3749_v35  ;;  %vm3050_vm0 = vmpackc.low %vm181_vm9, %vm174_vm10  ;;  %3301 = vmatpush3.bf16.msra.mxu1 %v4233_v51  ;;  %v2781_v55 = vsel %vm168_vm1, 1.0, %v5009_v16  ;;  %vm194_vm10 = vcmp.eq.s32.totalorder %v4146_v29, 3  ;;  %vm202_vm9 = vcmp.eq.s32.totalorder %v4148_v30, 3  ;;  %vm210_vm1 = vcmp.eq.s32.totalorder %v4052_v15, 3 }
  0xcb   :  { %v553_v58 = vpack.c.bf16 %v2781_v55, %v2774_v52  ;;  %3302 = vmatprep.subr.bf16.mxu1 %v4250_v56  ;;  %v2823_v25 = vsel %vm210_vm1, 1.0, %v5009_v16 }
  0xce   :  { %3303 = vmatpush3.bf16.msra.mxu1 %v4253_v59 }
  0xcf   :  { %3304 = vmatprep.subr.bf16.mxu1 %v4268_v62 }
  0xd0   :  { %3045 = vmatmul.mubr.msk.bf16.gmra.mxu0 %vm3044_vm6, %v5011_v57  ;;  %vm195_vm6 = vcmp.eq.s32.totalorder %v4126_v20, 3 }
  0xd1   :  { %3071 = vmatmul.mubr.msk.bf16.gmra.mxu1 %vm1221_vm3, %v532_v41  ;;  %3047 = vmatprep.mubr.msk.bf16.mxu0 %vm3046_vm5, %v5011_v57  ;;  %vm3052_vm5 = vmpackc.low %vm180_vm4, %vm173_vm2  ;;  %vm182_vm2 = vcmp.eq.s32.totalorder %v4052_v15, 2  ;;  %vm201_vm4 = vcmp.eq.s32.totalorder %v4168_v33, 3  ;;  %v4307_v15 = vld [vmem:[#allocation7 + $0x50] sm:$0xff]  }
  0xd2   :  { %1703 = vmatprep.mubr.bf16.mxu1 %v3749_v35  ;;  %vm3054_vm13 = vmpackc.low %vm195_vm6, %vm188_vm7  ;;  %v2795_v61 = vsel %vm182_vm2, 1.0, %v5009_v16  ;;  %vm208_vm7 = vcmp.eq.s32.totalorder %v4170_v34, 3  ;;  %3305 = vmatpush3.bf16.msra.mxu1 %v4271_v0 }
  0xd3   :  { %v560_v63 = vpack.c.bf16 %v2795_v61, %v2788_v60  ;;  %vm3060_vm6 = vmpackc.low %vm208_vm7, %vm201_vm4  ;;  %3306 = vmatprep.subr.bf16.mxu1 %v4283_v8 }
  0xd8   :  { %3049 = vmatmul.mubr.msk.bf16.gmra.mxu0 %vm3048_vm11, %v5011_v57  ;;  %vm209_vm11 = vcmp.eq.s32.totalorder %v4150_v31, 3 }
  0xd9   :  { %3072 = vmatmul.mubr.msk.bf16.gmra.mxu1 %vm1221_vm3, %v539_v44  ;;  %3051 = vmatprep.mubr.msk.bf16.mxu0 %vm3050_vm0, %v5011_v57  ;;  %vm3056_vm0 = vmpackc.low %vm194_vm10, %vm187_vm12 }
  0xda   :  { %1713 = vmatprep.mubr.bf16.mxu1 %v3749_v35  ;;  %vm3058_vm14 = vmpackc.low %vm209_vm11, %vm202_vm9 }
  0xe0   :  { %3053 = vmatmul.mubr.msk.bf16.gmra.mxu0 %vm3052_vm5, %v5011_v57  ;;  %vm189_vm5 = vcmp.eq.s32.totalorder %v4033_v2, 3  ;;  %v4286_v2 = vld [vmem:[#allocation7 + $0x20] sm:$0xff]  }
  0xe1   :  { %3073 = vmatmul.mubr.msk.bf16.gmra.mxu1 %vm1221_vm3, %v546_v48  ;;  %3055 = vmatprep.mubr.msk.bf16.mxu0 %vm3054_vm13, %v5011_v57  ;;  %vm196_vm13 = vcmp.eq.s32.totalorder %v4041_v4, 3  ;;  %v2802_v1 = vsel %vm189_vm5, 1.0, %v5009_v16  ;;  %v2816_v4 = vsel %vm203_vm8, 1.0, %v5009_v16 }
  0xe2   :  { %1723 = vmatprep.mubr.bf16.mxu1 %v3749_v35  ;;  %v2809_v3 = vsel %vm196_vm13, 1.0, %v5009_v16  ;;  %3279 = vmatpush3.bf16.msra.mxu0 %v4286_v2  ;;  %v574_v5 = vpack.c.bf16 %v2823_v25, %v2816_v4 }
  0xe3   :  { %v567_v18 = vpack.c.bf16 %v2809_v3, %v2802_v1  ;;  %3307 = vmatpush3.bf16.msra.mxu1 %v4286_v2  ;;  %3280 = vmatprep.subr.bf16.mxu0 %v4297_v28 }
  0xe4   :  { %3308 = vmatprep.subr.bf16.mxu1 %v4297_v28 }
  0xe6   :  { %3281 = vmatpush3.bf16.msra.mxu0 %v4300_v49 }
  0xe7   :  { %3309 = vmatpush3.bf16.msra.mxu1 %v4300_v49  ;;  %3282 = vmatprep.subr.bf16.mxu0 %v4307_v15 }
  0xe8   :  { %3057 = vmatmul.mubr.msk.bf16.gmra.mxu0 %vm3056_vm0, %v5011_v57  ;;  %3310 = vmatprep.subr.bf16.mxu1 %v4307_v15 }
  0xe9   :  { %3074 = vmatmul.mubr.msk.bf16.gmra.mxu1 %vm1221_vm3, %v553_v58  ;;  %3059 = vmatprep.mubr.msk.bf16.mxu0 %vm3058_vm14, %v5011_v57 }
  0xea   :  { %1733 = vmatprep.mubr.bf16.mxu1 %v3749_v35  ;;  %3283 = vmatpush3.bf16.msra.mxu0 %v4310_v50 }
  0xeb   :  { %3311 = vmatpush3.bf16.msra.mxu1 %v4310_v50  ;;  %3284 = vmatprep.subr.bf16.mxu0 %v4320_v53 }
  0xec   :  { %3312 = vmatprep.subr.bf16.mxu1 %v4320_v53 }
  0xee   :  { %3285 = vmatpush3.bf16.msra.mxu0 %v4322_v6 }
  0xef   :  { %3313 = vmatpush3.bf16.msra.mxu1 %v4322_v6  ;;  %3286 = vmatprep.subr.bf16.mxu0 %v4328_v7 }
  0xf0   :  { %3061 = vmatmul.mubr.msk.bf16.gmra.mxu0 %vm3060_vm6, %v5011_v57  ;;  %3314 = vmatprep.subr.bf16.mxu1 %v4328_v7 }
  0xf1   :  { %3075 = vmatmul.mubr.msk.bf16.gmra.mxu1 %vm1221_vm3, %v560_v63 }
  0xf2   :  { %1743 = vmatprep.mubr.bf16.mxu1 %v3749_v35  ;;  %3287 = vmatpush3.bf16.msra.mxu0 %v4330_v9 }
  0xf3   :  { %3328 = vmatprep.subr.bf16.mxu0 %v4230_v47  ;;  %3315 = vmatpush3.bf16.msra.mxu1 %v4330_v9 }
  0xf4   :  { %3356 = vmatprep.subr.bf16.mxu1 %v4230_v47 }
  0xf9   :  { %3076 = vmatmul.mubr.msk.bf16.gmra.mxu1 %vm1221_vm3, %v567_v18 }
  0xfa   :  { %1753 = vmatprep.mubr.bf16.mxu1 %v3749_v35 }
 0x101   :  { %3077 = vmatmul.mubr.msk.bf16.gmra.mxu1 %vm1221_vm3, %v574_v5 }
 0x102   :  { %1763 = vmatprep.mubr.bf16.mxu1 %v3749_v35 }
 0x109   :  { %3078 = vmatmul.mubr.msk.bf16.gmra.mxu1 %vm1221_vm3, %v581_v26  ;;  %v723_v26 = vsub.s32 0, %v722_v21 }
 0x10a   :  { %1773 = vmatprep.mubr.bf16.mxu1 %v3749_v35 }
 0x111   :  { %3079 = vmatmul.mubr.msk.bf16.gmra.mxu1 %vm1221_vm3, %v588_v27  ;;  %v4345_v27 = vrot.slane %v719_v22, %v723_v26 }
 0x128   :  { %v1286_v11 = vpop.f32.mrf.mxu0 }
 0x129   :  { %v1419_v12 = vpop.f32.mrf.mxu1  ;;  %v1287_v13 = vadd.f32 %v1286_v11, %v4345_v27 }
 0x12a   :  { %v1288_v14 = vpop.f32.mrf.mxu0 }
 0x12b   :  { %v1421_v19 = vpop.f32.mrf.mxu1  ;;  %v4350_v20 = vadd.f32 %v1419_v12, %v1287_v13  ;;  %v1289_v23 = vadd.f32 %v1288_v14, %v4347_v10 }
 0x12c   :  { %v1290_v24 = vpop.f32.mrf.mxu0 }
 0x12d   :  { %v1423_v29 = vpop.f32.mrf.mxu1  ;;  %v4353_v30 = vadd.f32 %v1421_v19, %v1289_v23  ;;  %v1291_v31 = vadd.f32 %v1290_v24, %v4345_v27 }
 0x12e   :  { %v1292_v32 = vpop.f32.mrf.mxu0 }
 0x12f   :  { %v1425_v33 = vpop.f32.mrf.mxu1  ;;  %v4356_v34 = vadd.f32 %v1423_v29, %v1291_v31  ;;  %v1293_v35 = vadd.f32 %v1292_v32, %v4347_v10 }
 0x130   :  { %v1296_v36 = vpop.f32.mrf.mxu0 }
 0x131   :  { %v1429_v37 = vpop.f32.mrf.mxu1  ;;  %v4359_v38 = vadd.f32 %v1425_v33, %v1293_v35  ;;  %v1297_v39 = vadd.f32 %v1296_v36, %v4345_v27 }
 0x132   :  { %v1298_v40 = vpop.f32.mrf.mxu0 }
 0x133   :  { %v1431_v41 = vpop.f32.mrf.mxu1  ;;  %v4362_v42 = vadd.f32 %v1429_v37, %v1297_v39  ;;  %v1299_v43 = vadd.f32 %v1298_v40, %v4347_v10 }
 0x134   :  { %v1300_v44 = vpop.f32.mrf.mxu0 }
 0x135   :  { %v1433_v45 = vpop.f32.mrf.mxu1  ;;  %v4365_v46 = vadd.f32 %v1431_v41, %v1299_v43  ;;  %v1301_v48 = vadd.f32 %v1300_v44, %v4345_v27 }
 0x136   :  { %v1302_v52 = vpop.f32.mrf.mxu0 }
 0x137   :  { %v1435_v55 = vpop.f32.mrf.mxu1  ;;  %v4368_v58 = vadd.f32 %v1433_v45, %v1301_v48  ;;  %v1303_v60 = vadd.f32 %v1302_v52, %v4347_v10 }
 0x138   :  { %v1306_v61 = vpop.f32.mrf.mxu0 }
 0x139   :  { %v1439_v63 = vpop.f32.mrf.mxu1  ;;  %v4371_v1 = vadd.f32 %v1435_v55, %v1303_v60  ;;  %v1307_v3 = vadd.f32 %v1306_v61, %v4345_v27 }
 0x13a   :  { %v1308_v18 = vpop.f32.mrf.mxu0 }
 0x13b   :  { %v1441_v4 = vpop.f32.mrf.mxu1  ;;  %v4374_v25 = vadd.f32 %v1439_v63, %v1307_v3  ;;  %v1309_v5 = vadd.f32 %v1308_v18, %v4347_v10 }
 0x13c   :  { %v1310_v17 = vpop.f32.mrf.mxu0 }
 0x13d   :  { %v1443_v21 = vpop.f32.mrf.mxu1  ;;  %v4377_v26 = vadd.f32 %v1441_v4, %v1309_v5  ;;  %v1311_v22 = vadd.f32 %v1310_v17, %v4345_v27 }
 0x13e   :  { %v1312_v54 = vpop.f32.mrf.mxu0 }
 0x13f   :  { %v1445_v11 = vpop.f32.mrf.mxu1  ;;  %v4380_v12 = vadd.f32 %v1443_v21, %v1311_v22  ;;  %v1313_v13 = vadd.f32 %v1312_v54, %v4347_v10 }
 0x140   :  { %v1316_v14 = vpop.f32.mrf.mxu0 }
 0x141   :  { %v1449_v19 = vpop.f32.mrf.mxu1  ;;  %v4383_v23 = vadd.f32 %v1445_v11, %v1313_v13  ;;  %v1317_v24 = vadd.f32 %v1316_v14, %v4345_v27 }
 0x142   :  { %v1318_v29 = vpop.f32.mrf.mxu0 }
 0x143   :  { %v1451_v31 = vpop.f32.mrf.mxu1  ;;  %v4386_v32 = vadd.f32 %v1449_v19, %v1317_v24  ;;  %v1319_v33 = vadd.f32 %v1318_v29, %v4347_v10 }
 0x144   :  { %v1320_v35 = vpop.f32.mrf.mxu0 }
 0x145   :  { %v1453_v36 = vpop.f32.mrf.mxu1  ;;  %v4389_v37 = vadd.f32 %v1451_v31, %v1319_v33  ;;  %v1321_v39 = vadd.f32 %v1320_v35, %v4345_v27 }
 0x146   :  { %v1322_v40 = vpop.f32.mrf.mxu0 }
 0x147   :  { %v1455_v41 = vpop.f32.mrf.mxu1  ;;  %v4392_v43 = vadd.f32 %v1453_v36, %v1321_v39  ;;  %v1323_v44 = vadd.f32 %v1322_v40, %v4347_v10 }
 0x148   :  { %v1326_v45 = vpop.f32.mrf.mxu0 }
 0x149   :  { %v1459_v48 = vpop.f32.mrf.mxu1  ;;  %v4395_v52 = vadd.f32 %v1455_v41, %v1323_v44  ;;  %v1327_v55 = vadd.f32 %v1326_v45, %v4345_v27 }
 0x14a   :  { %v1328_v60 = vpop.f32.mrf.mxu0 }
 0x14b   :  { %v1461_v61 = vpop.f32.mrf.mxu1  ;;  %v4398_v63 = vadd.f32 %v1459_v48, %v1327_v55  ;;  %v1329_v3 = vadd.f32 %v1328_v60, %v4347_v10 }
 0x14c   :  { %v1330_v18 = vpop.f32.mrf.mxu0 }
 0x14d   :  { %v1463_v4 = vpop.f32.mrf.mxu1  ;;  %v4401_v5 = vadd.f32 %v1461_v61, %v1329_v3  ;;  %v1331_v17 = vadd.f32 %v1330_v18, %v4345_v27 }
 0x14e   :  { %v1332_v21 = vpop.f32.mrf.mxu0 }
 0x14f   :  { %v1465_v22 = vpop.f32.mrf.mxu1  ;;  %v4404_v54 = vadd.f32 %v1463_v4, %v1331_v17  ;;  %v1333_v11 = vadd.f32 %v1332_v21, %v4347_v10 }
 0x150   :  { %v1336_v13 = vpop.f32.mrf.mxu0 }
 0x151   :  { %v1469_v14 = vpop.f32.mrf.mxu1  ;;  %v4407_v19 = vadd.f32 %v1465_v22, %v1333_v11  ;;  %v1337_v24 = vadd.f32 %v1336_v13, %v4345_v27 }
 0x152   :  { %v1338_v29 = vpop.f32.mrf.mxu0 }
 0x153   :  { %v1471_v31 = vpop.f32.mrf.mxu1  ;;  %v4410_v33 = vadd.f32 %v1469_v14, %v1337_v24  ;;  %v1339_v35 = vadd.f32 %v1338_v29, %v4347_v10 }
 0x154   :  { %v1340_v36 = vpop.f32.mrf.mxu0 }
 0x155   :  { %v1473_v39 = vpop.f32.mrf.mxu1  ;;  %v4413_v40 = vadd.f32 %v1471_v31, %v1339_v35  ;;  %v1341_v41 = vadd.f32 %v1340_v36, %v4345_v27 }
 0x156   :  { %v1342_v44 = vpop.f32.mrf.mxu0 }
 0x157   :  { %v1475_v45 = vpop.f32.mrf.mxu1  ;;  %v4416_v48 = vadd.f32 %v1473_v39, %v1341_v41  ;;  %v1343_v55 = vadd.f32 %v1342_v44, %v4347_v10 }
 0x158   :  { %v1346_v60 = vpop.f32.mrf.mxu0 }
 0x159   :  { %v1479_v61 = vpop.f32.mrf.mxu1  ;;  %v4419_v3 = vadd.f32 %v1475_v45, %v1343_v55  ;;  %v1347_v18 = vadd.f32 %v1346_v60, %v4345_v27 }
 0x15a   :  { %v1348_v4 = vpop.f32.mrf.mxu0 }
 0x15b   :  { %5068 = vst [vmem:[#allocation17_spill] sm:$0xff] %v4419_v3  ;;  %v1481_v17 = vpop.f32.mrf.mxu1  ;;  %v4422_v21 = vadd.f32 %v1479_v61, %v1347_v18  ;;  %v1349_v22 = vadd.f32 %v1348_v4, %v4347_v10 }
 0x15c   :  { %v1350_v11 = vpop.f32.mrf.mxu0 }
 0x15d   :  { %5069 = vst [vmem:[#allocation18_spill] sm:$0xff] %v4422_v21  ;;  %v1483_v13 = vpop.f32.mrf.mxu1  ;;  %v4425_v14 = vadd.f32 %v1481_v17, %v1349_v22  ;;  %v1351_v24 = vadd.f32 %v1350_v11, %v4345_v27 }
 0x15e   :  { %v1352_v29 = vpop.f32.mrf.mxu0 }
 0x15f   :  { %5070 = vst [vmem:[#allocation19_spill] sm:$0xff] %v4425_v14  ;;  %v1485_v31 = vpop.f32.mrf.mxu1  ;;  %v4428_v35 = vadd.f32 %v1483_v13, %v1351_v24  ;;  %v1353_v36 = vadd.f32 %v1352_v29, %v4347_v10 }
 0x160   :  { %v1356_v39 = vpop.f32.mrf.mxu0 }
 0x161   :  { %5071 = vst [vmem:[#allocation20_spill] sm:$0xff] %v4428_v35  ;;  %v1489_v41 = vpop.f32.mrf.mxu1  ;;  %v4431_v44 = vadd.f32 %v1485_v31, %v1353_v36  ;;  %v1357_v45 = vadd.f32 %v1356_v39, %v4345_v27 }
 0x162   :  { %v1358_v55 = vpop.f32.mrf.mxu0 }
 0x163   :  { %5072 = vst [vmem:[#allocation21_spill] sm:$0xff] %v4431_v44  ;;  %v1491_v60 = vpop.f32.mrf.mxu1  ;;  %v4434_v61 = vadd.f32 %v1489_v41, %v1357_v45  ;;  %v1359_v18 = vadd.f32 %v1358_v55, %v4347_v10 }
 0x164   :  { %v1360_v4 = vpop.f32.mrf.mxu0 }
 0x165   :  { %5073 = vst [vmem:[#allocation22_spill] sm:$0xff] %v4434_v61  ;;  %v1493_v17 = vpop.f32.mrf.mxu1  ;;  %v4437_v22 = vadd.f32 %v1491_v60, %v1359_v18  ;;  %v1361_v11 = vadd.f32 %v1360_v4, %v4345_v27 }
 0x166   :  { %v1362_v13 = vpop.f32.mrf.mxu0 }
 0x167   :  { %5074 = vst [vmem:[#allocation23_spill] sm:$0xff] %v4437_v22  ;;  %v1495_v24 = vpop.f32.mrf.mxu1  ;;  %v4440_v29 = vadd.f32 %v1493_v17, %v1361_v11  ;;  %v1363_v31 = vadd.f32 %v1362_v13, %v4347_v10 }
 0x168   :  { %v1366_v36 = vpop.f32.mrf.mxu0 }
 0x169   :  { %5075 = vst [vmem:[#allocation24_spill] sm:$0xff] %v4440_v29  ;;  %v1499_v39 = vpop.f32.mrf.mxu1  ;;  %v4443_v16 = vadd.f32 %v1495_v24, %v1363_v31  ;;  %v1367_v41 = vadd.f32 %v1366_v36, %v4345_v27 }
 0x16a   :  { %v1368_v45 = vpop.f32.mrf.mxu0 }
 0x16b   :  { %5076 = vst [vmem:[#allocation25_spill] sm:$0xff] %v4443_v16  ;;  %v1501_v55 = vpop.f32.mrf.mxu1  ;;  %v1500_v57 = vadd.f32 %v1499_v39, %v1367_v41  ;;  %v1369_v60 = vadd.f32 %v1368_v45, %v4347_v10 }
 0x16c   :  { %v1370_v18 = vpop.f32.mrf.mxu0 }
 0x16d   :  { %v1503_v22 = vpop.f32.mrf.mxu1  ;;  %v1502_v4 = vadd.f32 %v1501_v55, %v1369_v60  ;;  %v1371_v61 = vadd.f32 %v1370_v18, %v4345_v27 }
 0x16e   :  { %v1372_v17 = vpop.f32.mrf.mxu0 }
 0x16f   :  { %v1505_v11 = vpop.f32.mrf.mxu1  ;;  %v1504_v29 = vadd.f32 %v1503_v22, %v1371_v61  ;;  %v1373_v13 = vadd.f32 %v1372_v17, %v4347_v10 }
 0x170   :  { %v1376_v44 = vpop.f32.mrf.mxu0 }
 0x171   :  { %v1509_v24 = vpop.f32.mrf.mxu1  ;;  %v1506_v31 = vadd.f32 %v1505_v11, %v1373_v13  ;;  %v1377_v36 = vadd.f32 %v1376_v44, %v4345_v27 }
 0x172   :  { %v1378_v16 = vpop.f32.mrf.mxu0 }
 0x173   :  { %v1511_v35 = vpop.f32.mrf.mxu1  ;;  %v1510_v39 = vadd.f32 %v1509_v24, %v1377_v36  ;;  %v1379_v41 = vadd.f32 %v1378_v16, %v4347_v10 }
 0x174   :  { %v1380_v45 = vpop.f32.mrf.mxu0 }
 0x175   :  { %v1513_v14 = vpop.f32.mrf.mxu1  ;;  %v1512_v55 = vadd.f32 %v1511_v35, %v1379_v41  ;;  %v1381_v60 = vadd.f32 %v1380_v45, %v4345_v27 }
 0x176   :  { %v1382_v18 = vpop.f32.mrf.mxu0 }
 0x177   :  { %v1515_v21 = vpop.f32.mrf.mxu1  ;;  %v1514_v61 = vadd.f32 %v1513_v14, %v1381_v60  ;;  %v1383_v22 = vadd.f32 %v1382_v18, %v4347_v10 }
 0x178   :  { %v1552_v17 = vpop.f32.mrf.mxu0 }
 0x179   :  { %v1632_v47 = vpop.f32.mrf.mxu1  ;;  %v1516_v11 = vadd.f32 %v1515_v21, %v1383_v22 }
 0x17a   :  { %v4453_v13 = vadd.f32 %v1632_v47, %v1500_v57  ;;  %v1554_v44 = vpop.f32.mrf.mxu0 }
 0x17b   :  { %v1634_v9 = vpop.f32.mrf.mxu1 }
 0x17c   :  { %v4455_v24 = vadd.f32 %v1634_v9, %v1502_v4  ;;  %v1556_v16 = vpop.f32.mrf.mxu0 }
 0x17d   :  { %v1636_v36 = vpop.f32.mrf.mxu1 }
 0x17e   :  { %v4457_v3 = vadd.f32 %v1636_v36, %v1504_v29  ;;  %v1558_v35 = vpop.f32.mrf.mxu0 }
 0x17f   :  { %v1638_v27 = vpop.f32.mrf.mxu1 }
 0x180   :  { %5077 = vst [vmem:[#allocation26_spill] sm:$0xff] %v4457_v3  ;;  %v4459_v41 = vadd.f32 %v1638_v27, %v1506_v31  ;;  %v1562_v14 = vpop.f32.mrf.mxu0  ;;  %v1553_v31 = vadd.f32 %v1552_v17, %v4350_v20 }
 0x181   :  { %v1642_v45 = vpop.f32.mrf.mxu1 }
 0x182   :  { %5078 = vst [vmem:[#allocation27_spill] sm:$0xff] %v4459_v41  ;;  %v4461_v10 = vadd.f32 %v1642_v45, %v1510_v39  ;;  %v1564_v60 = vpop.f32.mrf.mxu0  ;;  %v1555_v39 = vadd.f32 %v1554_v44, %v4353_v30  ;;  %v1557_v45 = vadd.f32 %v1556_v16, %v4356_v34 }
 0x183   :  { %v1644_v21 = vpop.f32.mrf.mxu1  ;;  %v1565_v44 = vadd.f32 %v1564_v60, %v4365_v46 }
 0x184   :  { %v4463_v57 = vadd.f32 %v1644_v21, %v1512_v55  ;;  %v1566_v47 = vpop.f32.mrf.mxu0 }
 0x185   :  { %v1646_v18 = vpop.f32.mrf.mxu1  ;;  %v1567_v16 = vadd.f32 %v1566_v47, %v4368_v58 }
 0x186   :  { %5079 = vst [vmem:[#allocation28_spill] sm:$0xff] %v4463_v57  ;;  %v4465_v9 = vadd.f32 %v1646_v18, %v1514_v61  ;;  %v1568_v4 = vpop.f32.mrf.mxu0  ;;  %v1559_v61 = vadd.f32 %v1558_v35, %v4359_v38 }
 0x187   :  { %v1648_v22 = vpop.f32.mrf.mxu1 }
 0x188   :  { %5080 = vst [vmem:[#allocation29_spill] sm:$0xff] %v4465_v9  ;;  %v4467_v29 = vadd.f32 %v1648_v22, %v1516_v11  ;;  %v1572_v36 = vpop.f32.mrf.mxu0 }
 0x189   :  { %v1685_v3 = vpop.f32.mrf.mxu1  ;;  %v1573_v58 = vadd.f32 %v1572_v36, %v4374_v25 }
 0x18a   :  { %v1574_v27 = vpop.f32.mrf.mxu0  ;;  %v1686_v55 = vadd.f32 %v1685_v3, %v1553_v31  ;;  %v1563_v3 = vadd.f32 %v1562_v14, %v4362_v42 }
 0x18b   :  { %v1687_v41 = vpop.f32.mrf.mxu1  ;;  %v1575_v25 = vadd.f32 %v1574_v27, %v4377_v26 }
 0x18c   :  { %v1576_v21 = vpop.f32.mrf.mxu0  ;;  %v4473_v18 = vadd.f32 %v1687_v41, %v1555_v39  ;;  %vm1809_vm3 = vcmp.gt.f32.partialorder %v1686_v55, 1.0  ;;  %v5081_v41 = vmov 1.0|1.0  }
 0x18d   :  { %v1689_v57 = vpop.f32.mrf.mxu1  ;;  %v1577_v26 = vadd.f32 %v1576_v21, %v4380_v12 }
 0x18e   :  { %v4475_v9 = vadd.f32 %v1689_v57, %v1557_v45  ;;  %v1578_v11 = vpop.f32.mrf.mxu0  ;;  %vm1810_vm9 = vcmp.gt.f32.partialorder %v4473_v18, 1.0  ;;  %v1569_v57 = vadd.f32 %v1568_v4, %v4371_v1  ;;  %v2034_v1 = vmul.f32 0.9, %v1686_v55 }
 0x18f   :  { %v1691_v22 = vpop.f32.mrf.mxu1 }
 0x190   :  { %vm1811_vm12 = vcmp.gt.f32.partialorder %v4475_v9, 1.0  ;;  %v4478_v20 = vadd.f32 %v1691_v22, %v1559_v61  ;;  %v1582_v30 = vpop.f32.mrf.mxu0 }
 0x191   :  { %vm3107_vm10 = vmpackc.low %vm1811_vm12, %vm1809_vm3  ;;  %v1695_v34 = vpop.f32.mrf.mxu1  ;;  %v1583_v61 = vadd.f32 %v1582_v30, %v4386_v32 }
 0x192   :  { %vm1812_vm11 = vcmp.gt.f32.partialorder %v4478_v20, 1.0  ;;  %v4486_v38 = vpop.f32.mrf.mxu0  ;;  %v4494_v35 = vadd.f32 %v1695_v34, %v1563_v3  ;;  %v2035_v3 = vmul.f32 0.9, %v4473_v18 }
 0x193   :  { %v1697_v17 = vpop.f32.mrf.mxu1  ;;  %vm3105_vm0 = vmpackc.low %vm1812_vm11, %vm1810_vm9  ;;  %v1585_v30 = vadd.f32 %v4486_v38, %v4389_v37 }
 0x194   :  { %3106 = vmatprep.mubr.msk.bf16.mxu0 %vm3105_vm0, %v5081_v41  ;;  %v1586_v42 = vpop.f32.mrf.mxu0  ;;  %v4499_v31 = vadd.f32 %v1697_v17, %v1565_v44  ;;  %vm1813_vm14 = vcmp.gt.f32.partialorder %v4494_v35, 1.0  ;;  %v5084_v44 = vmov 0.0  }
 0x195   :  { %v1699_v14 = vpop.f32.mrf.mxu1  ;;  %3108 = vmatmul.mubr.msk.bf16.vlgmr.msra.gmra.mxu0 %vm3107_vm10, %v5081_v41  ;;  %v2027_v55 = vsel %vm1810_vm9, 1.0, %v5084_v44  ;;  %v2029_v32 = vsel %vm1812_vm11, 1.0, %v5084_v44 }
 0x196   :  { %v4501_v39 = vadd.f32 %v1699_v14, %v1567_v16  ;;  %3329 = vmatpush3.bf16.msra.mxu0 %v4233_v51  ;;  %v4504_v45 = vpop.f32.mrf.mxu0  ;;  %vm1814_vm4 = vcmp.gt.f32.partialorder %v4499_v31, 1.0  ;;  %v2026_v16 = vsel %vm1809_vm3, 1.0, %v5084_v44  ;;  %v2036_v14 = vmul.f32 0.9, %v4475_v9 }
 0x197   :  { %v1701_v46 = vpop.f32.mrf.mxu1  ;;  %3330 = vmatprep.subr.bf16.mxu0 %v4250_v56  ;;  %v2030_v9 = vsel %vm1813_vm14, 1.0, %v5084_v44  ;;  %v1589_v37 = vadd.f32 %v4504_v45, %v4395_v52  ;;  %v2031_v52 = vsel %vm1814_vm4, 1.0, %v5084_v44 }
 0x198   :  { %vm1815_vm15 = vcmp.gt.f32.partialorder %v4501_v39, 1.0  ;;  %v4510_v60 = vadd.f32 %v1701_v46, %v1569_v57  ;;  %v4512_v47 = vpop.f32.mrf.mxu0 }
 0x199   :  { %v1705_v4 = vpop.f32.mrf.mxu1  ;;  %vm4518_vm2 = vmpackc.low %vm1815_vm15, %vm1813_vm14 }
 0x19a   :  { %vm1816_vm7 = vcmp.gt.f32.partialorder %v4510_v60, 1.0  ;;  %v1706_v36 = vadd.f32 %v1705_v4, %v1573_v58  ;;  %3331 = vmatpush3.bf16.msra.mxu0 %v4253_v59  ;;  %v4526_v22 = vpop.f32.mrf.mxu0  ;;  %v1579_v58 = vadd.f32 %v1578_v11, %v4383_v23 }
 0x19b   :  { %v1707_v34 = vpop.f32.mrf.mxu1  ;;  %vm3109_vm6 = vmpackc.low %vm1816_vm7, %vm1814_vm4  ;;  %3332 = vmatprep.subr.bf16.mxu0 %v4268_v62 }
 0x19c   :  { %v2042_v27 = vadd.f32 %v2034_v1, %v1706_v36  ;;  %v1708_v17 = vadd.f32 %v1707_v34, %v1575_v25  ;;  %3110 = vmatprep.mubr.msk.bf16.mxu0 %vm3109_vm6, %v5081_v41  ;;  %v4539_v57 = vpop.f32.mrf.mxu0  ;;  %v2037_v1 = vmul.f32 0.9, %v4478_v20 }
 0x19d   :  { %v1709_v46 = vpop.f32.mrf.mxu1  ;;  %3112 = vmatmul.mubr.msk.bf16.gmra.mxu0 %vm4518_vm2, %v5081_v41 }
 0x19e   :  { %v4545_v4 = vsub.f32 %v2042_v27, %v2026_v16  ;;  %v2043_v12 = vadd.f32 %v2035_v3, %v1708_v17  ;;  %v1710_v21 = vadd.f32 %v1709_v46, %v1577_v26  ;;  %3333 = vmatpush3.bf16.msra.mxu0 %v4271_v0  ;;  %v4552_v25 = vpop.f32.mrf.mxu0  ;;  %v2028_v3 = vsel %vm1811_vm12, 1.0, %v5084_v44 }
 0x19f   :  { %v1711_v36 = vpop.f32.mrf.mxu1  ;;  %3334 = vmatprep.subr.bf16.mxu0 %v4283_v8  ;;  %v2038_v27 = vmul.f32 0.9, %v4494_v35  ;;  %v2039_v35 = vmul.f32 0.9, %v4499_v31  ;;  %v2032_v31 = vsel %vm1815_vm15, 1.0, %v5084_v44 }
 0x1a0   :  { %v4556_v23 = vsub.f32 %v2043_v12, %v2027_v55  ;;  %v2044_v11 = vadd.f32 %v2036_v14, %v1710_v21  ;;  %v1712_v34 = vadd.f32 %v1711_v36, %v1579_v58  ;;  %v4561_v26 = vpop.f32.mrf.mxu0  ;;  %v1587_v14 = vadd.f32 %v1586_v42, %v4392_v43 }
 0x1a1   :  { %v1715_v18 = vpop.f32.mrf.mxu1  ;;  %vm2058_vm13 = vcmp.gt.f32.partialorder %v4545_v4, 1.0  ;;  %v2040_v55 = vmul.f32 0.9, %v4501_v39  ;;  %v1597_v39 = vadd.f32 %v4539_v57, %v4404_v54 }
 0x1a2   :  { %v4564_v17 = vsub.f32 %v2044_v11, %v2028_v3  ;;  %v2045_v16 = vadd.f32 %v2037_v1, %v1712_v34  ;;  %v1716_v46 = vadd.f32 %v1715_v18, %v1583_v61  ;;  %3335 = vmatpush3.bf16.msra.mxu0 %v4286_v2  ;;  %v4576_v58 = vpop.f32.mrf.mxu0  ;;  %vm2059_vm1 = vcmp.gt.f32.partialorder %v4556_v23, 1.0 }
 0x1a3   :  { %v1717_v12 = vpop.f32.mrf.mxu1  ;;  %3336 = vmatprep.subr.bf16.mxu0 %v4297_v28  ;;  %v2041_v3 = vmul.f32 0.9, %v4510_v60  ;;  %v1593_v18 = vadd.f32 %v4512_v47, %v4398_v63  ;;  %v1599_v60 = vadd.f32 %v4552_v25, %v4407_v19  ;;  %v2189_v54 = vsel %vm2058_vm13, 1.0, %v5084_v44 }
 0x1a4   :  { %vm2060_vm5 = vcmp.gt.f32.partialorder %v4564_v17, 1.0  ;;  %v4580_v21 = vsub.f32 %v2045_v16, %v2029_v32  ;;  %v2046_v20 = vadd.f32 %v2038_v27, %v1716_v46  ;;  %v1718_v43 = vadd.f32 %v1717_v12, %v1585_v30  ;;  %v4587_v38 = vpop.f32.mrf.mxu0 }
 0x1a5   :  { %v1719_v42 = vpop.f32.mrf.mxu1  ;;  %vm4593_vm8 = vmpackc.low %vm2060_vm5, %vm2058_vm13  ;;  %v1595_v46 = vadd.f32 %v4526_v22, %v4401_v5  ;;  %v2197_v12 = vmul.f32 0.9, %v4545_v4  ;;  %v2033_v5 = vsel %vm1816_vm7, 1.0, %v5084_v44  ;;  %v1603_v4 = vadd.f32 %v4561_v26, %v4410_v33 }
 0x1a6   :  { %v4597_v36 = vsub.f32 %v2046_v20, %v2030_v9  ;;  %v1720_v61 = vadd.f32 %v1719_v42, %v1587_v14  ;;  %vm2061_vm3 = vcmp.gt.f32.partialorder %v4580_v21, 1.0  ;;  %3337 = vmatpush3.bf16.msra.mxu0 %v4300_v49  ;;  %v2047_v45 = vadd.f32 %v2039_v35, %v1718_v43  ;;  %v4605_v11 = vpop.f32.mrf.mxu0 }
 0x1a7   :  { %v1721_v34 = vpop.f32.mrf.mxu1  ;;  %vm3129_vm12 = vmpackc.low %vm2061_vm3, %vm2059_vm1  ;;  %3338 = vmatprep.subr.bf16.mxu0 %v4307_v15  ;;  %v2190_v25 = vsel %vm2059_vm1, 1.0, %v5084_v44  ;;  %v2191_v33 = vsel %vm2060_vm5, 1.0, %v5084_v44 }
 0x1a8   :  { %v2048_v27 = vadd.f32 %v2040_v55, %v1720_v61  ;;  %v1722_v16 = vadd.f32 %v1721_v34, %v1589_v37  ;;  %3130 = vmatprep.mubr.msk.bf16.mxu1 %vm3129_vm12, %v5081_v41  ;;  %v4621_v32 = vsub.f32 %v2047_v45, %v2031_v52  ;;  %v4623_v9 = vpop.f32.mrf.mxu0  ;;  %vm2062_vm10 = vcmp.gt.f32.partialorder %v4597_v36, 1.0 }
 0x1a9   :  { %v1725_v30 = vpop.f32.mrf.mxu1  ;;  %3132 = vmatmul.mubr.msk.bf16.vlgmr.msra.gmra.mxu1 %vm4593_vm8, %v5081_v41  ;;  %v2199_v52 = vmul.f32 0.9, %v4564_v17  ;;  %v1607_v17 = vadd.f32 %v4587_v38, %v4416_v48  ;;  %v5091_v48 = vld [vmem:[#allocation15_spill] sm:$0xff] }
 0x1aa   :  { %v4628_v63 = vsub.f32 %v2048_v27, %v2032_v31  ;;  %v2049_v47 = vadd.f32 %v2041_v3, %v1722_v16  ;;  %v1726_v14 = vadd.f32 %v1725_v30, %v1593_v18  ;;  %3357 = vmatpush3.bf16.msra.mxu1 %v4233_v51  ;;  %v4637_v22 = vpop.f32.mrf.mxu0  ;;  %3339 = vmatpush3.bf16.msra.mxu0 %v4310_v50  ;;  %v2198_v51 = vmul.f32 0.9, %v4556_v23 }
 0x1ab   :  { %v1727_v20 = vpop.f32.mrf.mxu1  ;;  %3358 = vmatprep.subr.bf16.mxu1 %v4250_v56  ;;  %3340 = vmatprep.subr.bf16.mxu0 %v4320_v53  ;;  %vm2063_vm0 = vcmp.gt.f32.partialorder %v4621_v32, 1.0  ;;  %v2200_v18 = vmul.f32 0.9, %v4580_v21  ;;  %v1605_v30 = vadd.f32 %v4576_v58, %v4413_v40  ;;  %v2193_v58 = vsel %vm2062_vm10, 1.0, %v5084_v44 }
 0x1ac   :  { %v4641_v35 = vsub.f32 %v2049_v47, %v2033_v5  ;;  %v2205_v55 = vadd.f32 %v2197_v12, %v1726_v14  ;;  %v1728_v37 = vadd.f32 %v1727_v20, %v1595_v46  ;;  %vm2064_vm9 = vcmp.gt.f32.partialorder %v4628_v63, 1.0  ;;  %v4654_v1 = vpop.f32.mrf.mxu0  ;;  %v5089_v47 = vld [vmem:[#allocation17_spill] sm:$0xff] }
 0x1ad   :  { %v1729_v57 = vpop.f32.mrf.mxu1  ;;  %vm4662_vm11 = vmpackc.low %vm2064_vm9, %vm2062_vm10  ;;  %v2201_v46 = vmul.f32 0.9, %v4597_v36  ;;  %v1609_v14 = vadd.f32 %v4605_v11, %v5089_v47  ;;  %v2192_v12 = vsel %vm2061_vm3, 1.0, %v5084_v44  ;;  %v2203_v11 = vmul.f32 0.9, %v4628_v63  ;;  %v5094_v36 = vld [vmem:[#allocation18_spill] sm:$0xff] }
 0x1ae   :  { %v4652_v43 = vsub.f32 %v2205_v55, %v2189_v54  ;;  %v2206_v42 = vadd.f32 %v2198_v51, %v1728_v37  ;;  %v1730_v61 = vadd.f32 %v1729_v57, %v1597_v39  ;;  %3359 = vmatpush3.bf16.msra.mxu1 %v4253_v59  ;;  %vm2065_vm14 = vcmp.gt.f32.partialorder %v4641_v35, 1.0  ;;  %3341 = vmatpush3.bf16.msra.mxu0 %v4322_v6  ;;  %v4689_v27 = vpop.f32.mrf.mxu0  ;;  %v5090_v39 = vld [vmem:[#allocation16_spill] sm:$0xff] }
 0x1af   :  { %v1731_v45 = vpop.f32.mrf.mxu1  ;;  %3360 = vmatprep.subr.bf16.mxu1 %v4268_v62  ;;  %vm3133_vm15 = vmpackc.low %vm2065_vm14, %vm2063_vm0  ;;  %3342 = vmatprep.subr.bf16.mxu0 %v4328_v7  ;;  %v2204_v19 = vmul.f32 0.9, %v4641_v35  ;;  %v2196_v63 = vsel %vm2065_vm14, 1.0, %v5084_v44 }
 0x1b0   :  { %v4675_v59 = vsub.f32 %v2206_v42, %v2190_v25  ;;  %v2207_v34 = vadd.f32 %v2199_v52, %v1730_v61  ;;  %v1732_v3 = vadd.f32 %v1731_v45, %v1599_v60  ;;  %3134 = vmatprep.mubr.msk.bf16.mxu1 %vm3133_vm15, %v5081_v41  ;;  %vm2221_vm4 = vcmp.gt.f32.partialorder %v4652_v43, 1.0  ;;  %v1622_v55 = vpop.f32.mrf.mxu0 }
 0x1b1   :  { %v1735_v23 = vpop.f32.mrf.mxu1  ;;  %3136 = vmatmul.mubr.msk.bf16.gmra.mxu1 %vm4662_vm11, %v5081_v41  ;;  %v1613_v60 = vadd.f32 %v4623_v9, %v5094_v36  ;;  %v2194_v42 = vsel %vm2063_vm0, 1.0, %v5084_v44  ;;  %v5095_v9 = vld [vmem:[#allocation19_spill] sm:$0xff]  ;;  %v2195_v25 = vsel %vm2064_vm9, 1.0, %v5084_v44 }
 0x1b2   :  { %v4687_v26 = vsub.f32 %v2207_v34, %v2191_v33  ;;  %v2208_v16 = vadd.f32 %v2200_v18, %v1732_v3  ;;  %v1736_v31 = vadd.f32 %v1735_v23, %v1603_v4  ;;  %3361 = vmatpush3.bf16.msra.mxu1 %v4271_v0  ;;  %3343 = vmatpush3.bf16.msra.mxu0 %v5090_v39  ;;  %v2202_v0 = vmul.f32 0.9, %v4621_v32  ;;  %v1624_v32 = vpop.f32.mrf.mxu0  ;;  %v3619_v33 = vld [vmem:[#allocation7 + $0x38] sm:$0xff]  }
 0x1b3   :  { %v1737_v5 = vpop.f32.mrf.mxu1  ;;  %3362 = vmatprep.subr.bf16.mxu1 %v4283_v8  ;;  %3384 = vmatprep.subr.bf16.mxu0 %v5091_v48  ;;  %vm2222_vm6 = vcmp.gt.f32.partialorder %v4675_v59, 1.0 }
 0x1b4   :  { %vm2223_vm2 = vcmp.gt.f32.partialorder %v4687_v26, 1.0  ;;  %v4707_v20 = vsub.f32 %v2208_v16, %v2192_v12  ;;  %v2209_v40 = vadd.f32 %v2201_v46, %v1736_v31  ;;  %v1738_v21 = vadd.f32 %v1737_v5, %v1605_v30 }
 0x1b5   :  { %v1739_v38 = vpop.f32.mrf.mxu1  ;;  %vm4721_vm7 = vmpackc.low %vm2223_vm2, %vm2221_vm4  ;;  %v2361_v31 = vmul.f32 0.9, %v4675_v59  ;;  %v5101_v59 = vld [vmem:[#allocation23_spill] sm:$0xff] }
 0x1b6   :  { %v4725_v37 = vsub.f32 %v2209_v40, %v2193_v58  ;;  %v1740_v51 = vadd.f32 %v1739_v38, %v1607_v17  ;;  %vm2224_vm5 = vcmp.gt.f32.partialorder %v4707_v20, 1.0  ;;  %v2210_v54 = vadd.f32 %v2202_v0, %v1738_v21  ;;  %3363 = vmatpush3.bf16.msra.mxu1 %v4286_v2  ;;  %v5100_v40 = vld [vmem:[#allocation22_spill] sm:$0xff] }
 0x1b7   :  { %v1741_v57 = vpop.f32.mrf.mxu1  ;;  %vm3153_vm13 = vmpackc.low %vm2224_vm5, %vm2222_vm6  ;;  %3364 = vmatprep.subr.bf16.mxu1 %v4297_v28  ;;  %v1615_v2 = vadd.f32 %v4637_v22, %v5095_v9  ;;  %v2360_v28 = vmul.f32 0.9, %v4652_v43  ;;  %v5096_v22 = vld [vmem:[#allocation20_spill] sm:$0xff]  ;;  %v3620_v43 = vld [vmem:[#allocation7 + $0x30] sm:$0xff]   ;;  %v1623_v48 = vadd.f32 %v1622_v55, %v5100_v40  ;;  %v2353_v58 = vsel %vm2222_vm6, 1.0, %v5084_v44 }
 0x1b8   :  { %v2211_v61 = vadd.f32 %v2203_v11, %v1740_v51  ;;  %v1742_v52 = vadd.f32 %v1741_v57, %v1609_v14  ;;  %3154 = vmatprep.mubr.msk.bf16.mxu0 %vm3153_vm13, %v5081_v41  ;;  %v4744_v4 = vsub.f32 %v2210_v54, %v2194_v42  ;;  %v1617_v23 = vadd.f32 %v4654_v1, %v5096_v22  ;;  %v5097_v1 = vld [vmem:[#allocation21_spill] sm:$0xff]  ;;  %v1626_v14 = vpop.f32.mrf.mxu0  ;;  %v3621_v42 = vld [vmem:[#allocation7 + $0x28] sm:$0xff]  }
 0x1b9   :  { %v1745_v45 = vpop.f32.mrf.mxu1  ;;  %3156 = vmatmul.mubr.msk.bf16.vlgmr.msra.gmra.mxu0 %vm4721_vm7, %v5081_v41  ;;  %vm2225_vm8 = vcmp.gt.f32.partialorder %v4725_v37, 1.0  ;;  %v1619_v35 = vadd.f32 %v4689_v27, %v5097_v1  ;;  %v2363_v8 = vmul.f32 0.9, %v4707_v20  ;;  %v2354_v55 = vsel %vm2223_vm2, 1.0, %v5084_v44  ;;  %v3622_v9 = vld [vmem:[#allocation7 + $0x60] sm:$0xff]  }
 0x1ba   :  { %v4752_v34 = vsub.f32 %v2211_v61, %v2195_v25  ;;  %v2212_v3 = vadd.f32 %v2204_v19, %v1742_v52  ;;  %v1746_v18 = vadd.f32 %v1745_v45, %v1613_v60  ;;  %3385 = vmatpush3.bf16.msra.mxu0 %v3619_v33  ;;  %3365 = vmatpush3.bf16.msra.mxu1 %v4300_v49  ;;  %v2352_v49 = vsel %vm2221_vm4, 1.0, %v5084_v44 }
 0x1bb   :  { %v1747_v16 = vpop.f32.mrf.mxu1  ;;  %3386 = vmatprep.subr.bf16.mxu0 %v4250_v56  ;;  %3366 = vmatprep.subr.bf16.mxu1 %v4307_v15  ;;  %v2362_v56 = vmul.f32 0.9, %v4687_v26  ;;  %vm2226_vm3 = vcmp.gt.f32.partialorder %v4744_v4, 1.0  ;;  %v2364_v57 = vmul.f32 0.9, %v4725_v37  ;;  %v2355_v26 = vsel %vm2224_vm5, 1.0, %v5084_v44 }
 0x1bc   :  { %v4764_v46 = vsub.f32 %v2212_v3, %v2196_v63  ;;  %v2368_v30 = vadd.f32 %v2360_v28, %v1746_v18  ;;  %v1748_v17 = vadd.f32 %v1747_v16, %v1615_v2  ;;  %vm2227_vm1 = vcmp.gt.f32.partialorder %v4752_v34, 1.0  ;;  %v3624_v16 = vld [vmem:[#allocation7 + $0x58] sm:$0xff]  }
 0x1bd   :  { %v1749_v47 = vpop.f32.mrf.mxu1  ;;  %vm4779_vm12 = vmpackc.low %vm2227_vm1, %vm2225_vm8  ;;  %v2365_v19 = vmul.f32 0.9, %v4744_v4  ;;  %v2366_v18 = vmul.f32 0.9, %v4752_v34  ;;  %v2357_v37 = vsel %vm2226_vm3, 1.0, %v5084_v44  ;;  %v3625_v15 = vld [vmem:[#allocation7 + $0x18] sm:$0xff]  }
 0x1be   :  { %v4783_v12 = vsub.f32 %v2368_v30, %v2352_v49  ;;  %v2369_v27 = vadd.f32 %v2361_v31, %v1748_v17  ;;  %v1750_v5 = vadd.f32 %v1749_v47, %v1617_v23  ;;  %3387 = vmatpush3.bf16.msra.mxu0 %v3620_v43  ;;  %vm2228_vm10 = vcmp.gt.f32.partialorder %v4764_v46, 1.0  ;;  %3367 = vmatpush3.bf16.msra.mxu1 %v4310_v50  ;;  %v3623_v23 = vld [vmem:[#allocation7 + $0x20] sm:$0xff]  }
 0x1bf   :  { %v1751_v21 = vpop.f32.mrf.mxu1  ;;  %vm3157_vm9 = vmpackc.low %vm2228_vm10, %vm2226_vm3  ;;  %3388 = vmatprep.subr.bf16.mxu0 %v4268_v62  ;;  %3368 = vmatprep.subr.bf16.mxu1 %v4320_v53  ;;  %v1625_v50 = vadd.f32 %v1624_v32, %v5101_v59  ;;  %v1628_v62 = vpop.f32.mrf.mxu0  ;;  %v5102_v53 = vld [vmem:[#allocation24_spill] sm:$0xff]  ;;  %v5103_v32 = vld [vmem:[#allocation25_spill] sm:$0xff]  ;;  %v2367_v1 = vmul.f32 0.9, %v4764_v46 }
 0x1c0   :  { %v4796_v0 = vsub.f32 %v2369_v27, %v2353_v58  ;;  %v2370_v38 = vadd.f32 %v2362_v56, %v1750_v5  ;;  %v1752_v11 = vadd.f32 %v1751_v21, %v1619_v35  ;;  %3158 = vmatprep.mubr.msk.bf16.mxu0 %vm3157_vm9, %v5081_v41  ;;  %v1627_v61 = vadd.f32 %v1626_v14, %v5102_v53  ;;  %v3626_v5 = vld [vmem:[#allocation7 + $0x50] sm:$0xff]  }
 0x1c1   :  { %v1755_v51 = vpop.f32.mrf.mxu1  ;;  %3160 = vmatmul.mubr.msk.bf16.gmra.mxu0 %vm4779_vm12, %v5081_v41  ;;  %vm2384_vm11 = vcmp.gt.f32.partialorder %v4783_v12, 1.0  ;;  %v1629_v20 = vadd.f32 %v1628_v62, %v5103_v32  ;;  %v2523_v56 = vmul.f32 0.9, %v4783_v12  ;;  %v2359_v14 = vsel %vm2228_vm10, 1.0, %v5084_v44  ;;  %v3627_v59 = vld [vmem:[#allocation7 + $0x10] sm:$0xff]  }
 0x1c2   :  { %v4808_v36 = vsub.f32 %v2370_v38, %v2354_v55  ;;  %v2371_v60 = vadd.f32 %v2363_v8, %v1752_v11  ;;  %v1756_v54 = vadd.f32 %v1755_v51, %v1623_v48  ;;  %3389 = vmatpush3.bf16.msra.mxu0 %v3621_v42  ;;  %3369 = vmatpush3.bf16.msra.mxu1 %v4322_v6  ;;  %v2356_v6 = vsel %vm2225_vm8, 1.0, %v5084_v44  ;;  %v5108_v11 = vld [vmem:[#allocation26_spill] sm:$0xff] }
 0x1c3   :  { %v1757_v52 = vpop.f32.mrf.mxu1  ;;  %3390 = vmatprep.subr.bf16.mxu0 %v3622_v9  ;;  %3370 = vmatprep.subr.bf16.mxu1 %v4328_v7  ;;  %vm2385_vm14 = vcmp.gt.f32.partialorder %v4796_v0, 1.0  ;;  %v2524_v27 = vmul.f32 0.9, %v4796_v0  ;;  %v2515_v48 = vsel %vm2384_vm11, 1.0, %v5084_v44  ;;  %v3628_v55 = vld [vmem:[#allocation7 + $0x48] sm:$0xff]  }
 0x1c4   :  { %vm2386_vm0 = vcmp.gt.f32.partialorder %v4808_v36, 1.0  ;;  %v4819_v2 = vsub.f32 %v2371_v60, %v2355_v26  ;;  %v2372_v25 = vadd.f32 %v2364_v57, %v1756_v54  ;;  %v1758_v45 = vadd.f32 %v1757_v52, %v1625_v50  ;;  %v5109_v60 = vld [vmem:[#allocation27_spill] sm:$0xff] }
 0x1c5   :  { %v1759_v3 = vpop.f32.mrf.mxu1  ;;  %vm4832_vm15 = vmpackc.low %vm2386_vm0, %vm2384_vm11  ;;  %v2525_v58 = vmul.f32 0.9, %v4808_v36  ;;  %v2516_v12 = vsel %vm2385_vm14, 1.0, %v5084_v44  ;;  %v2517_v0 = vsel %vm2386_vm0, 1.0, %v5084_v44 }
 0x1c6   :  { %v4836_v7 = vsub.f32 %v2372_v25, %v2356_v6  ;;  %v2373_v33 = vadd.f32 %v2365_v19, %v1758_v45  ;;  %v1760_v22 = vadd.f32 %v1759_v3, %v1627_v61  ;;  %3391 = vmatpush3.bf16.msra.mxu0 %v3623_v23  ;;  %vm2387_vm2 = vcmp.gt.f32.partialorder %v4819_v2, 1.0  ;;  %3371 = vmatpush3.bf16.msra.mxu1 %v5090_v39  ;;  %v3629_v19 = vld [vmem:[#allocation7 + $0x8] sm:$0xff]   ;;  %v5114_v3 = vld [vmem:[#allocation28_spill] sm:$0xff] }
 0x1c7   :  { %v1761_v63 = vpop.f32.mrf.mxu1  ;;  %vm3177_vm4 = vmpackc.low %vm2387_vm2, %vm2385_vm14  ;;  %3392 = vmatprep.subr.bf16.mxu0 %v3624_v16  ;;  %v2358_v39 = vsel %vm2227_vm1, 1.0, %v5084_v44  ;;  %v2526_v57 = vmul.f32 0.9, %v4819_v2  ;;  %v2518_v36 = vsel %vm2387_vm2, 1.0, %v5084_v44  ;;  %v3631_v16 = vld [vmem:[#allocation7] sm:$0xff]  }
 0x1c8   :  { %v4847_v31 = vsub.f32 %v2373_v33, %v2357_v37  ;;  %v2374_v30 = vadd.f32 %v2366_v18, %v1760_v22  ;;  %v1762_v17 = vadd.f32 %v1761_v63, %v1629_v20  ;;  %3178 = vmatprep.mubr.msk.bf16.mxu1 %vm3177_vm4, %v5081_v41  ;;  %vm2388_vm7 = vcmp.gt.f32.partialorder %v4836_v7, 1.0  ;;  %v5115_v37 = vld [vmem:[#allocation29_spill] sm:$0xff] }
 0x1c9   :  { %v1765_v4 = vpop.f32.mrf.mxu1  ;;  %3180 = vmatmul.mubr.msk.bf16.vlgmr.msra.gmra.mxu1 %vm4832_vm15, %v5081_v41  ;;  %v2527_v52 = vmul.f32 0.9, %v4836_v7  ;;  %v2519_v2 = vsel %vm2388_vm7, 1.0, %v5084_v44 }
 0x1ca   :  { %v4854_v35 = vsub.f32 %v2374_v30, %v2358_v39  ;;  %v2375_v49 = vadd.f32 %v2367_v1, %v1762_v17  ;;  %v1766_v47 = vadd.f32 %v1765_v4, %v4453_v13  ;;  %3393 = vmatpush3.bf16.msra.mxu0 %v3625_v15  ;;  %vm2389_vm5 = vcmp.gt.f32.partialorder %v4847_v31, 1.0  ;;  %v4948_v15 = vld [vmem:[%s5006_s4] ss:$0 sm:$0xff]  ;;  %s3750_s4 = smov [#allocation9]  }
 0x1cb   :  { %v1767_v34 = vpop.f32.mrf.mxu1  ;;  %3394 = vmatprep.subr.bf16.mxu0 %v3626_v5  ;;  %v2528_v45 = vmul.f32 0.9, %v4847_v31  ;;  %v2520_v30 = vsel %vm2389_vm5, 1.0, %v5084_v44  ;;  %s2695_s16 = sshll.u32 %s3750_s4, 4  ;;  %s2696_s16 = int_to_ptr.vmem [resolvable:$true] %s2695_s16 }
 0x1cc   :  { %v4866_v13 = vsub.f32 %v2375_v49, %v2359_v14  ;;  %v2531_v43 = vadd.f32 %v2523_v56, %v1766_v47  ;;  %v1768_v40 = vadd.f32 %v1767_v34, %v4455_v24  ;;  %vm2390_vm6 = vcmp.gt.f32.partialorder %v4854_v35, 1.0  ;;  %s3692_s19 = scalar_lea.vmem %s2696_s16, 2560  ;;  %p3697_p2 = scmp.lt.s32.totalorder %s2696_s16, %s2696_s16 }
 0x1cd   :  { %v1769_v46 = vpop.f32.mrf.mxu1  ;;  %vm4879_vm13 = vmpackc.low %vm2390_vm6, %vm2388_vm7  ;;  %v2529_v33 = vmul.f32 0.9, %v4854_v35  ;;  %v2521_v49 = vsel %vm2390_vm6, 1.0, %v5084_v44  ;;  %p3693_p1 = scmp.ne.s32.totalorder %s2696_s16, %s3692_s19  ;;  %p3698_p3 = scmp.lt.s32.totalorder %s3692_s19, %s3692_s19 }
 0x1ce   :  { %v2539_v24 = vsub.f32 %v2531_v43, %v2515_v48  ;;  %v2532_v38 = vadd.f32 %v2524_v27, %v1768_v40  ;;  %v1770_v8 = vadd.f32 %v1769_v46, %v5108_v11  ;;  %3395 = vmatpush3.bf16.msra.mxu0 %v3627_v59  ;;  %vm2391_vm8 = vcmp.gt.f32.partialorder %v4866_v13, 1.0 }
 0x1cf   :  { %v1771_v50 = vpop.f32.mrf.mxu1  ;;  %vm3181_vm1 = vmpackc.low %vm2391_vm8, %vm2389_vm5  ;;  %3396 = vmatprep.subr.bf16.mxu0 %v3628_v55  ;;  %v2530_v4 = vmul.f32 0.9, %v4866_v13  ;;  %p3699_p4 = por %p3698_p3, %p3697_p2 }
 0x1d0   :  { %v2540_v51 = vsub.f32 %v2532_v38, %v2516_v12  ;;  %v2533_v62 = vadd.f32 %v2525_v58, %v1770_v8  ;;  %v1772_v54 = vadd.f32 %v1771_v50, %v5109_v60  ;;  %3182 = vmatprep.mubr.msk.bf16.mxu1 %vm3181_vm1, %v5081_v41  ;;  %vm4903_vm3 = vcmp.gt.f32.partialorder %v2539_v24, 1.0 }
 0x1d1   :  { %v1775_v42 = vpop.f32.mrf.mxu1  ;;  %3184 = vmatmul.mubr.msk.bf16.gmra.mxu1 %vm4879_vm13, %v5081_v41  ;;  %p3700_p5 = pnand %p3699_p4, %p3693_p1 }
 0x1d2   :  { %v2541_v53 = vsub.f32 %v2533_v62, %v2517_v0  ;;  %v2534_v61 = vadd.f32 %v2526_v57, %v1772_v54  ;;  %v1776_v26 = vadd.f32 %v1775_v42, %v4461_v10  ;;  %3397 = vmatpush3.bf16.msra.mxu0 %v3629_v19  ;;  %v3630_v10 = vld [vmem:[#allocation7 + $0x40] sm:$0xff]   ;;  %vm2548_vm9 = vcmp.gt.f32.partialorder %v2540_v51, 1.0 }
 0x1d3   :  { %v1777_v25 = vpop.f32.mrf.mxu1  ;;  %3398 = vmatprep.subr.bf16.mxu0 %v3630_v10 }
 0x1d4   :  { %vm4911_vm12 = vcmp.gt.f32.partialorder %v2541_v53, 1.0  ;;  %v2542_v20 = vsub.f32 %v2534_v61, %v2518_v36  ;;  %v2535_v6 = vadd.f32 %v2527_v52, %v1776_v26  ;;  %v1778_v18 = vadd.f32 %v1777_v25, %v5114_v3 }
 0x1d5   :  { %vm3203_vm10 = vmpackc.low %vm4911_vm12, %vm4903_vm3  ;;  %v1779_v28 = vpop.f32.mrf.mxu1 }
 0x1d6   :  { %v2543_v22 = vsub.f32 %v2535_v6, %v2519_v2  ;;  %v2536_v23 = vadd.f32 %v2528_v45, %v1778_v18  ;;  %v1780_v63 = vadd.f32 %v1779_v28, %v5115_v37  ;;  %3399 = vmatpush3.bf16.msra.mxu0 %v3631_v16  ;;  %vm2550_vm11 = vcmp.gt.f32.partialorder %v2542_v20, 1.0 }
 0x1d7   :  { %v1781_v17 = vpop.f32.mrf.mxu1  ;;  %vm3201_vm0 = vmpackc.low %vm2550_vm11, %vm2548_vm9 }
 0x1d8   :  { %v2544_v1 = vsub.f32 %v2536_v23, %v2520_v30  ;;  %v2537_v7 = vadd.f32 %v2529_v33, %v1780_v63  ;;  %v1782_v39 = vadd.f32 %v1781_v17, %v4467_v29  ;;  %3202 = vmatprep.mubr.msk.bf16.mxu0 %vm3201_vm0, %v5081_v41  ;;  %v2522_v29 = vsel %vm2391_vm8, 1.0, %v5084_v44 }
 0x1d9   :  { %3204 = vmatmul.mubr.msk.bf16.vlgmr.msra.gmra.mxu0 %vm3203_vm10, %v5081_v41  ;;  %vm2551_vm14 = vcmp.gt.f32.partialorder %v2543_v22, 1.0 }
 0x1da   :  { %v2545_v31 = vsub.f32 %v2537_v7, %v2521_v49  ;;  %v2538_v47 = vadd.f32 %v2530_v4, %v1782_v39  ;;  %vm2552_vm4 = vcmp.gt.f32.partialorder %v2544_v1, 1.0 }
 0x1dc   :  { %v2546_v56 = vsub.f32 %v2538_v47, %v2522_v29  ;;  %vm2553_vm15 = vcmp.gt.f32.partialorder %v2545_v31, 1.0 }
 0x1dd   :  { %vm3207_vm2 = vmpackc.low %vm2553_vm15, %vm2551_vm14 }
 0x1de   :  { %vm2554_vm7 = vcmp.gt.f32.partialorder %v2546_v56, 1.0 }
 0x1df   :  { %vm3205_vm6 = vmpackc.low %vm2554_vm7, %vm2552_vm4 }
 0x1e0   :  { %3206 = vmatprep.mubr.msk.bf16.mxu0 %vm3205_vm6, %v5081_v41 }
 0x1e1   :  { %3208 = vmatmul.mubr.msk.bf16.gmra.mxu0 %vm3207_vm2, %v5081_v41 }
 0x255   :  { %v3288_v35 = vpop.f32.mrf.mxu0 }
 0x257   :  { %v3289_v14 = vpop.f32.mrf.mxu0 }
 0x258   :  { %v3290_v34 = vadd.f32 %v3289_v14, %v3288_v35 }
 0x259   :  { %v3291_v27 = vpop.f32.mrf.mxu0 }
 0x25a   :  { %v1968_v5 = vadd.f32 %v3290_v34, %v4948_v15 }
 0x25b   :  { %v3292_v13 = vpop.f32.mrf.mxu0 }
 0x25c   :  { %2022 = vst [vmem:[#allocation9] sm:$0xff] %v1968_v5  ;;  %v3293_v43 = vadd.f32 %v3292_v13, %v3291_v27  ;;  %vm1990_vm5 = vcmp.gt.f32.partialorder %v1968_v5, 1.0  ;;  %v2139_v42 = vmul.f32 0.9, %v1968_v5 }
 0x25d   :  { %v3294_v40 = vpop.f32.mrf.mxu0  ;;  %v3113_v21 = vsel %vm1990_vm5, 1.0, %v5084_v44 }
 0x25e   :  { %v1971_v48 = vadd.f32 %v3293_v43, %v4948_v15 }
 0x25f   :  { %v3295_v46 = vpop.f32.mrf.mxu0 }
 0x260   :  { %vm1991_vm13 = vcmp.gt.f32.partialorder %v1971_v48, 1.0  ;;  %2023 = vst [vmem:[#allocation9 + $0x8] sm:$0xff] %v1971_v48  ;;  %v3296_v41 = vadd.f32 %v3295_v46, %v3294_v40  ;;  %v2140_v9 = vmul.f32 0.9, %v1971_v48 }
 0x261   :  { %v3297_v58 = vpop.f32.mrf.mxu0  ;;  %v3114_v24 = vsel %vm1991_vm13, 1.0, %v5084_v44 }
 0x262   :  { %v1976_v38 = vadd.f32 %v3296_v41, %v4948_v15  ;;  %v3238_v11 = vpack.c.bf16 %v3114_v24, %v3113_v21 }
 0x263   :  { %v3298_v8 = vpop.f32.mrf.mxu0 }
 0x264   :  { %2024 = vst [vmem:[#allocation9 + $0x10] sm:$0xff] %v1976_v38  ;;  %v3299_v59 = vadd.f32 %v3298_v8, %v3297_v58  ;;  %3239 = vst [vmem:[#allocation8] sm:$0xff] %v3238_v11   ;;  %vm1992_vm8 = vcmp.gt.f32.partialorder %v1976_v38, 1.0  ;;  %v2141_v3 = vmul.f32 0.9, %v1976_v38 }
 0x265   :  { %v3115_v55 = vsel %vm1992_vm8, 1.0, %v5084_v44 }
 0x266   :  { %v1979_v12 = vadd.f32 %v3299_v59, %v4948_v15 }
 0x268   :  { %vm1993_vm1 = vcmp.gt.f32.partialorder %v1979_v12, 1.0  ;;  %2025 = vst [vmem:[#allocation9 + $0x18] sm:$0xff] %v1979_v12  ;;  %v2142_v30 = vmul.f32 0.9, %v1979_v12 }
 0x269   :  { %v3316_v50 = vpop.f32.mrf.mxu1  ;;  %v3116_v51 = vsel %vm1993_vm1, 1.0, %v5084_v44 }
 0x26a   :  { %v3241_v62 = vpack.c.bf16 %v3116_v51, %v3115_v55 }
 0x26b   :  { %v3317_v60 = vpop.f32.mrf.mxu1 }
 0x26c   :  { %v3318_v54 = vadd.f32 %v3317_v60, %v3316_v50  ;;  %3267 = vst [vmem:[#allocation8 + $0x8] sm:$0xff] %v3241_v62  }
 0x26d   :  { %v3319_v57 = vpop.f32.mrf.mxu1 }
 0x26e   :  { %v2121_v0 = vadd.f32 %v3318_v54, %v4948_v15 }
 0x26f   :  { %v3320_v53 = vpop.f32.mrf.mxu1 }
 0x270   :  { %v2143_v61 = vadd.f32 %v2139_v42, %v2121_v0  ;;  %v3321_v26 = vadd.f32 %v3320_v53, %v3319_v57 }
 0x271   :  { %v3322_v36 = vpop.f32.mrf.mxu1 }
 0x272   :  { %v2147_v52 = vsub.f32 %v2143_v61, %v3113_v21  ;;  %v2124_v19 = vadd.f32 %v3321_v26, %v4948_v15 }
 0x273   :  { %v3323_v45 = vpop.f32.mrf.mxu1 }
 0x274   :  { %2185 = vst [vmem:[#allocation9 + $0x20] sm:$0xff] %v2147_v52  ;;  %v2144_v25 = vadd.f32 %v2140_v9, %v2124_v19  ;;  %v3324_v10 = vadd.f32 %v3323_v45, %v3322_v36  ;;  %vm2151_vm3 = vcmp.gt.f32.partialorder %v2147_v52, 1.0  ;;  %v2302_v49 = vmul.f32 0.9, %v2147_v52 }
 0x275   :  { %v3325_v20 = vpop.f32.mrf.mxu1  ;;  %v3137_v22 = vsel %vm2151_vm3, 1.0, %v5084_v44 }
 0x276   :  { %v2148_v32 = vsub.f32 %v2144_v25, %v3114_v24  ;;  %v2129_v6 = vadd.f32 %v3324_v10, %v4948_v15 }
 0x277   :  { %v3326_v18 = vpop.f32.mrf.mxu1 }
 0x278   :  { %2186 = vst [vmem:[#allocation9 + $0x28] sm:$0xff] %v2148_v32  ;;  %vm2152_vm12 = vcmp.gt.f32.partialorder %v2148_v32, 1.0  ;;  %v2145_v2 = vadd.f32 %v2141_v3, %v2129_v6  ;;  %v3327_v28 = vadd.f32 %v3326_v18, %v3325_v20  ;;  %v2303_v35 = vmul.f32 0.9, %v2148_v32 }
 0x279   :  { %v3344_v33 = vpop.f32.mrf.mxu0  ;;  %v3138_v23 = vsel %vm2152_vm12, 1.0, %v5084_v44 }
 0x27a   :  { %v3244_v37 = vpack.c.bf16 %v3138_v23, %v3137_v22  ;;  %v2149_v63 = vsub.f32 %v2145_v2, %v3115_v55  ;;  %v2132_v16 = vadd.f32 %v3327_v28, %v4948_v15 }
 0x27b   :  { %v3345_v17 = vpop.f32.mrf.mxu0 }
 0x27c   :  { %v3346_v1 = vadd.f32 %v3345_v17, %v3344_v33  ;;  %3245 = vst [vmem:[#allocation8 + $0x10] sm:$0xff] %v3244_v37   ;;  %2187 = vst [vmem:[#allocation9 + $0x30] sm:$0xff] %v2149_v63  ;;  %v2146_v7 = vadd.f32 %v2142_v30, %v2132_v16  ;;  %vm2153_vm10 = vcmp.gt.f32.partialorder %v2149_v63, 1.0  ;;  %v2304_v24 = vmul.f32 0.9, %v2149_v63 }
 0x27d   :  { %v3347_v39 = vpop.f32.mrf.mxu0  ;;  %v3139_v5 = vsel %vm2153_vm10, 1.0, %v5084_v44 }
 0x27e   :  { %v2284_v4 = vadd.f32 %v3346_v1, %v4948_v15  ;;  %v2150_v31 = vsub.f32 %v2146_v7, %v3116_v51 }
 0x27f   :  { %v3348_v47 = vpop.f32.mrf.mxu0 }
 0x280   :  { %v2306_v29 = vadd.f32 %v2302_v49, %v2284_v4  ;;  %v3349_v56 = vadd.f32 %v3348_v47, %v3347_v39  ;;  %2188 = vst [vmem:[#allocation9 + $0x38] sm:$0xff] %v2150_v31  ;;  %vm2154_vm9 = vcmp.gt.f32.partialorder %v2150_v31, 1.0  ;;  %v2305_v51 = vmul.f32 0.9, %v2150_v31 }
 0x281   :  { %v3350_v14 = vpop.f32.mrf.mxu0  ;;  %v3140_v13 = vsel %vm2154_vm9, 1.0, %v5084_v44 }
 0x282   :  { %v2310_v34 = vsub.f32 %v2306_v29, %v3137_v22  ;;  %v2287_v27 = vadd.f32 %v3349_v56, %v4948_v15  ;;  %v3247_v40 = vpack.c.bf16 %v3140_v13, %v3139_v5 }
 0x283   :  { %v3351_v43 = vpop.f32.mrf.mxu0 }
 0x284   :  { %2348 = vst [vmem:[#allocation9 + $0x40] sm:$0xff] %v2310_v34  ;;  %v2307_v48 = vadd.f32 %v2303_v35, %v2287_v27  ;;  %v3352_v46 = vadd.f32 %v3351_v43, %v3350_v14  ;;  %3268 = vst [vmem:[#allocation8 + $0x18] sm:$0xff] %v3247_v40   ;;  %vm2314_vm11 = vcmp.gt.f32.partialorder %v2310_v34, 1.0  ;;  %v2465_v26 = vmul.f32 0.9, %v2310_v34 }
 0x285   :  { %v3353_v41 = vpop.f32.mrf.mxu0  ;;  %v3161_v59 = vsel %vm2314_vm11, 1.0, %v5084_v44 }
 0x286   :  { %v2311_v58 = vsub.f32 %v2307_v48, %v3138_v23  ;;  %v2292_v21 = vadd.f32 %v3352_v46, %v4948_v15 }
 0x287   :  { %v3354_v38 = vpop.f32.mrf.mxu0 }
 0x288   :  { %2349 = vst [vmem:[#allocation9 + $0x48] sm:$0xff] %v2311_v58  ;;  %v2308_v11 = vadd.f32 %v2304_v24, %v2292_v21  ;;  %v3355_v8 = vadd.f32 %v3354_v38, %v3353_v41  ;;  %vm2315_vm0 = vcmp.gt.f32.partialorder %v2311_v58, 1.0  ;;  %v2466_v6 = vmul.f32 0.9, %v2311_v58 }
 0x289   :  { %v3162_v12 = vsel %vm2315_vm0, 1.0, %v5084_v44  ;;  %v3372_v62 = vpop.f32.mrf.mxu1 }
 0x28a   :  { %v2312_v50 = vsub.f32 %v2308_v11, %v3139_v5  ;;  %v2295_v55 = vadd.f32 %v3355_v8, %v4948_v15  ;;  %v3250_v60 = vpack.c.bf16 %v3162_v12, %v3161_v59 }
 0x28b   :  { %v3373_v57 = vpop.f32.mrf.mxu1 }
 0x28c   :  { %2350 = vst [vmem:[#allocation9 + $0x50] sm:$0xff] %v2312_v50  ;;  %v2309_v54 = vadd.f32 %v2305_v51, %v2295_v55  ;;  %3251 = vst [vmem:[#allocation8 + $0x20] sm:$0xff] %v3250_v60   ;;  %v3374_v0 = vadd.f32 %v3373_v57, %v3372_v62  ;;  %vm2316_vm14 = vcmp.gt.f32.partialorder %v2312_v50, 1.0  ;;  %v2467_v23 = vmul.f32 0.9, %v2312_v50 }
 0x28d   :  { %v3375_v53 = vpop.f32.mrf.mxu1  ;;  %v3163_v36 = vsel %vm2316_vm14, 1.0, %v5084_v44 }
 0x28e   :  { %v2313_v42 = vsub.f32 %v2309_v54, %v3140_v13  ;;  %v2447_v61 = vadd.f32 %v3374_v0, %v4948_v15 }
 0x28f   :  { %v3376_v52 = vpop.f32.mrf.mxu1 }
 0x290   :  { %2351 = vst [vmem:[#allocation9 + $0x58] sm:$0xff] %v2313_v42  ;;  %vm2317_vm15 = vcmp.gt.f32.partialorder %v2313_v42, 1.0  ;;  %v2469_v19 = vadd.f32 %v2465_v26, %v2447_v61  ;;  %v3377_v9 = vadd.f32 %v3376_v52, %v3375_v53  ;;  %v2468_v4 = vmul.f32 0.9, %v2313_v42 }
 0x291   :  { %v3164_v25 = vsel %vm2317_vm15, 1.0, %v5084_v44  ;;  %v3378_v45 = vpop.f32.mrf.mxu1 }
 0x292   :  { %v3253_v10 = vpack.c.bf16 %v3164_v25, %v3163_v36  ;;  %v2473_v32 = vsub.f32 %v2469_v19, %v3161_v59  ;;  %v2450_v20 = vadd.f32 %v3377_v9, %v4948_v15 }
 0x293   :  { %v3379_v3 = vpop.f32.mrf.mxu1 }
 0x294   :  { %3269 = vst [vmem:[#allocation8 + $0x28] sm:$0xff] %v3253_v10   ;;  %2511 = vst [vmem:[#allocation9 + $0x60] sm:$0xff] %v2473_v32  ;;  %v2470_v18 = vadd.f32 %v2466_v6, %v2450_v20  ;;  %v3380_v2 = vadd.f32 %v3379_v3, %v3378_v45  ;;  %vm2477_vm2 = vcmp.gt.f32.partialorder %v2473_v32, 1.0  ;;  %v2628_v14 = vmul.f32 0.9, %v2473_v32 }
 0x295   :  { %v3381_v28 = vpop.f32.mrf.mxu1  ;;  %v3185_v17 = vsel %vm2477_vm2, 1.0, %v5084_v44 }
 0x296   :  { %v2474_v33 = vsub.f32 %v2470_v18, %v3162_v12  ;;  %v2455_v22 = vadd.f32 %v3380_v2, %v4948_v15 }
 0x297   :  { %v3382_v37 = vpop.f32.mrf.mxu1 }
 0x298   :  { %2512 = vst [vmem:[#allocation9 + $0x68] sm:$0xff] %v2474_v33  ;;  %v2471_v63 = vadd.f32 %v2467_v23, %v2455_v22  ;;  %v3383_v16 = vadd.f32 %v3382_v37, %v3381_v28  ;;  %vm2478_vm4 = vcmp.gt.f32.partialorder %v2474_v33, 1.0  ;;  %v2629_v43 = vmul.f32 0.9, %v2474_v33 }
 0x299   :  { %v3400_v30 = vpop.f32.mrf.mxu0  ;;  %v3186_v1 = vsel %vm2478_vm4, 1.0, %v5084_v44 }
 0x29a   :  { %v2475_v7 = vsub.f32 %v2471_v63, %v3163_v36  ;;  %v2458_v39 = vadd.f32 %v3383_v16, %v4948_v15  ;;  %v3256_v31 = vpack.c.bf16 %v3186_v1, %v3185_v17 }
 0x29b   :  { %v3401_v49 = vpop.f32.mrf.mxu0 }
 0x29c   :  { %v3402_v47 = vadd.f32 %v3401_v49, %v3400_v30  ;;  %2513 = vst [vmem:[#allocation9 + $0x70] sm:$0xff] %v2475_v7  ;;  %v2472_v29 = vadd.f32 %v2468_v4, %v2458_v39  ;;  %3257 = vst [vmem:[#allocation8 + $0x30] sm:$0xff] %v3256_v31   ;;  %vm2479_vm7 = vcmp.gt.f32.partialorder %v2475_v7, 1.0  ;;  %v2630_v50 = vmul.f32 0.9, %v2475_v7 }
 0x29d   :  { %v3403_v56 = vpop.f32.mrf.mxu0  ;;  %v3187_v41 = vsel %vm2479_vm7, 1.0, %v5084_v44 }
 0x29e   :  { %v2610_v35 = vadd.f32 %v3402_v47, %v4948_v15  ;;  %v2476_v34 = vsub.f32 %v2472_v29, %v3164_v25 }
 0x29f   :  { %v3404_v27 = vpop.f32.mrf.mxu0 }
 0x2a0   :  { %v2632_v5 = vadd.f32 %v2628_v14, %v2610_v35  ;;  %v3405_v13 = vadd.f32 %v3404_v27, %v3403_v56  ;;  %2514 = vst [vmem:[#allocation9 + $0x78] sm:$0xff] %v2476_v34  ;;  %vm2480_vm6 = vcmp.gt.f32.partialorder %v2476_v34, 1.0  ;;  %v2631_v53 = vmul.f32 0.9, %v2476_v34 }
 0x2a1   :  { %v3406_v40 = vpop.f32.mrf.mxu0  ;;  %v3188_v58 = vsel %vm2480_vm6, 1.0, %v5084_v44 }
 0x2a2   :  { %v2636_v48 = vsub.f32 %v2632_v5, %v3185_v17  ;;  %v2613_v46 = vadd.f32 %v3405_v13, %v4948_v15  ;;  %v3259_v24 = vpack.c.bf16 %v3188_v58, %v3187_v41 }
 0x2a3   :  { %v3407_v21 = vpop.f32.mrf.mxu0 }
 0x2a4   :  { %2674 = vst [vmem:[#allocation9 + $0x80] sm:$0xff] %v2636_v48  ;;  %v2633_v38 = vadd.f32 %v2629_v43, %v2613_v46  ;;  %v3408_v11 = vadd.f32 %v3407_v21, %v3406_v40  ;;  %3270 = vst [vmem:[#allocation8 + $0x38] sm:$0xff] %v3259_v24   ;;  %vm2640_vm5 = vcmp.gt.f32.partialorder %v2636_v48, 1.0 }
 0x2a5   :  { %v3409_v8 = vpop.f32.mrf.mxu0  ;;  %v3209_v60 = vsel %vm2640_vm5, 1.0, %v5084_v44 }
 0x2a6   :  { %v2637_v59 = vsub.f32 %v2633_v38, %v3186_v1  ;;  %v2618_v12 = vadd.f32 %v3408_v11, %v4948_v15 }
 0x2a7   :  { %v3410_v55 = vpop.f32.mrf.mxu0 }
 0x2a8   :  { %vm2641_vm13 = vcmp.gt.f32.partialorder %v2637_v59, 1.0  ;;  %2675 = vst [vmem:[#allocation9 + $0x88] sm:$0xff] %v2637_v59  ;;  %v2634_v51 = vadd.f32 %v2630_v50, %v2618_v12  ;;  %v3411_v62 = vadd.f32 %v3410_v55, %v3409_v8 }
 0x2a9   :  { %v3210_v54 = vsel %vm2641_vm13, 1.0, %v5084_v44 }
 0x2aa   :  { %v3262_v57 = vpack.c.bf16 %v3210_v54, %v3209_v60  ;;  %v2638_v0 = vsub.f32 %v2634_v51, %v3187_v41  ;;  %v2621_v42 = vadd.f32 %v3411_v62, %v4948_v15 }
 0x2ac   :  { %3263 = vst [vmem:[#allocation8 + $0x40] sm:$0xff] %v3262_v57   ;;  %2676 = vst [vmem:[#allocation9 + $0x90] sm:$0xff] %v2638_v0  ;;  %v2635_v61 = vadd.f32 %v2631_v53, %v2621_v42  ;;  %vm2642_vm8 = vcmp.gt.f32.partialorder %v2638_v0, 1.0 }
 0x2ad   :  { %v3211_v52 = vsel %vm2642_vm8, 1.0, %v5084_v44 }
 0x2ae   :  { %v2639_v26 = vsub.f32 %v2635_v61, %v3188_v58 }
 0x2b0   :  { %vm2643_vm1 = vcmp.gt.f32.partialorder %v2639_v26, 1.0  ;;  %2677 = vst [vmem:[#allocation9 + $0x98] sm:$0xff] %v2639_v26 }
 0x2b1   :  { %v3212_v19 = vsel %vm2643_vm1, 1.0, %v5084_v44 }
 0x2b2   :  { %3703 = shalt.err (!%p3700_p5)
}
 0x2b3   :  { %2701 = dma.vmem_to_hbm [thread:$0]  %s2696_s16, 2560, %s5008_s6, [#allocation10], %s3741_s24, %s3741_s24, %s3742_s25   ;;  %v3265_v15 = vpack.c.bf16 %v3212_v19, %v3211_v52 }
 0x2b4   :  { %s3712_s22 = scalar_lea.vmem %s2684_s18, 1280  ;;  %p3717_p7 = scmp.lt.s32.totalorder %s2684_s18, %s2684_s18 }
 0x2b5   :  { %3271 = vst [vmem:[#allocation8 + $0x48] sm:$0xff] %v3265_v15   ;;  %p3713_p6 = scmp.ne.s32.totalorder %s2684_s18, %s3712_s22  ;;  %p3718_p8 = scmp.lt.s32.totalorder %s3712_s22, %s3712_s22 }
 0x2b7   :  { %p3719_p9 = por %p3718_p8, %p3717_p7 }
 0x2b9   :  { %p3720_p10 = pnand %p3719_p9, %p3713_p6 }
 0x2bb   :  { %3723 = shalt.err (!%p3720_p10)
}
 0x2bc   :  { %2689 = dma.vmem_to_hbm [thread:$0]  %s2684_s18, 1280, %s5007_s5, [#allocation4], %s3745_s1, %s3745_s1, %s3746_s12  }
 0x2bd   :  { %3736 = dma.done.wait [#allocation4], 1280  }
 0x2be   :  { %3737 = vsyncadd [#allocation4], 4294966016 }
 0x2bf   :  { %3738 = dma.done.wait [#allocation10], 2560  }
 0x2c0   :  { %3739 = vsyncadd [#allocation10], 4294964736 }
 0x2c1   :  { %2708 = vsyncpa [#allocation3], 1 }
 0x2c2   :  { %2709 = vsyncpa [#allocation6], 1 }
 0x2c3   :  { %2710 = vsyncpa [#allocation4], 1 }
 0x2c4   :  { %2711 = vsyncpa [#allocation10], 1 }

</bundles_post_ra>
